<compile_context>
chip_gen: v7x
topology: tpu7x:2x2x1
jax: 0.10.0
libtpu: 0.0.40
codegen_flags: <defaults>
</compile_context>

<pallas_src>
import math
import functools

import jax
import jax.numpy as jnp
from jax.experimental import pallas as pl
from jax.experimental.pallas import tpu as pltpu


# ---------------------------------------------------------------------------
# Model configuration (mirrors ModelArgs / EncoderBlock.__init__)
# ---------------------------------------------------------------------------
DIM = 64
N_HEADS = 4
N_KV_HEADS = 2
HEAD_DIM = DIM // N_HEADS            # 16
N_REP = N_HEADS // N_KV_HEADS        # 2
NORM_EPS = 1e-5
FFN_DIM_MULTIPLIER = 1.0
MULTIPLE_OF = 128

_hidden = int(2 * (4 * DIM) / 3)
_hidden = int(FFN_DIM_MULTIPLIER * _hidden)
HIDDEN_DIM = MULTIPLE_OF * ((_hidden + MULTIPLE_OF - 1) // MULTIPLE_OF)   # 256

BATCH = 2
SEQ = 8
START_POS = 8                         # static (Python int in the torch forward too)
TOTAL = START_POS + SEQ               # cache length actually used


# ---------------------------------------------------------------------------
# Pallas kernel: norm -> attention (with KV cache) -> residual -> norm ->
#                SwiGLU FFN -> residual, all in one gridless invocation
#                (total VMEM footprint << 1 MiB, so no tiling / pipelining).
# ---------------------------------------------------------------------------
def encoder_block_kernel(
    x_ref, wqkv_ref, wo_ref, w13_ref, w2_ref,
    anorm_ref, fnorm_ref,
    cosq_ref, sinaq_ref, sinbq_ref, cosk_ref, sinak_ref, sinbk_ref,
    ck_ref, cv_ref,
    out_ref, newk_ref, newv_ref,
    *, B, S, P, n_heads, n_kv_heads, head_dim, hidden_dim, eps,
):
    f32 = jnp.float32
    n_rep = n_heads // n_kv_heads
    hd = head_dim
    M = B * S
    Fq = n_heads * hd
    Fk = n_kv_heads * hd

    x = x_ref[...]                                      # (M, D)

    def rmsnorm(v, w):                                  # v: (M, D), w: (1, D)
        ms = jnp.mean(v * v, axis=-1, keepdims=True)
        return (v * jax.lax.rsqrt(ms + eps)) * w

    def rope(v, cos, sin_a, sin_b):
        # Pairwise rotation:  out[2i]   = v[2i]*c_i - v[2i+1]*s_i
        #                     out[2i+1] = v[2i+1]*c_i + v[2i]*s_i
        # sin_a = -sin on even lanes / 0 on odd, sin_b = sin on odd lanes / 0 on
        # even; the wrapped lanes of the rolls are therefore multiplied by zero.
        return (v * cos
                + jnp.roll(v, -1, axis=-1) * sin_a
                + jnp.roll(v, 1, axis=-1) * sin_b)

    # ------------------------- attention branch ---------------------------
    h_in = rmsnorm(x, anorm_ref[...])
    # Fused QKV projection: one (M, D) @ (D, Fq + 2*Fk) MXU pass.
    qkv = jnp.dot(h_in, wqkv_ref[...], preferred_element_type=f32)
    xq = rope(qkv[:, :Fq], cosq_ref[...], sinaq_ref[...], sinbq_ref[...])
    xk = rope(qkv[:, Fq:Fq + Fk], cosk_ref[...], sinak_ref[...], sinbk_ref[...])
    xv = qkv[:, Fq + Fk:]

    # Only the O(S) new cache slice leaves the kernel (the caller splices it
    # into its cache buffer) -> no O(T) cache rewrite / writeback from here.
    newk_ref[...] = xk
    newv_ref[...] = xv

    xk3 = xk.reshape(B, S, Fk)
    xv3 = xv.reshape(B, S, Fk)
    if P > 0:                                           # static Python branch
        keys3 = jnp.concatenate([ck_ref[...], xk3], axis=1)   # (B, T, Fk)
        vals3 = jnp.concatenate([cv_ref[...], xv3], axis=1)
    else:
        keys3 = xk3
        vals3 = xv3
    xq3 = xq.reshape(B, S, Fq)

    # Batched GQA attention: one "super-batch" of size B * n_kv_heads, with the
    # n_rep query heads that share a KV head stacked along the row axis.
    # => 2 batched MXU contractions + ONE softmax over a single slab
    #    (no per-head matmul loop, no per-head softmax, no repeat_kv copy).
    q_grp, k_grp, v_grp = [], [], []
    for g in range(n_kv_heads):                         # trace-time only
        q_heads = [xq3[:, :, (g * n_rep + r) * hd:(g * n_rep + r + 1) * hd]
                   for r in range(n_rep)]
        q_grp.append(jnp.concatenate(q_heads, axis=1))  # (B, n_rep*S, hd)
        k_grp.append(keys3[:, :, g * hd:(g + 1) * hd])  # (B, T, hd)
        v_grp.append(vals3[:, :, g * hd:(g + 1) * hd])
    qb = jnp.concatenate(q_grp, axis=0)                 # (n_kv*B, n_rep*S, hd)
    kb = jnp.concatenate(k_grp, axis=0)                 # (n_kv*B, T, hd)
    vb = jnp.concatenate(v_grp, axis=0)

    scale = 1.0 / math.sqrt(hd)
    s = jnp.einsum('gsd,gtd->gst', qb, kb, preferred_element_type=f32) * scale
    p = jax.nn.softmax(s, axis=-1)        # no causal mask (matches the module)
    o = jnp.einsum('gst,gtd->gsd', p, vb, preferred_element_type=f32)

    head_cols = []
    for g in range(n_kv_heads):
        og = o[g * B:(g + 1) * B]                       # (B, n_rep*S, hd)
        for r in range(n_rep):
            head_cols.append(og[:, r * S:(r + 1) * S, :])   # head g*n_rep + r
    attn = jnp.concatenate(head_cols, axis=-1).reshape(M, Fq)

    h = x + jnp.dot(attn, wo_ref[...], preferred_element_type=f32)

    # ----------------------- SwiGLU feed-forward --------------------------
    hn = rmsnorm(h, fnorm_ref[...])
    # Fused W1/W3: one (M, D) @ (D, 2*hidden) MXU pass, slice at a 128 boundary.
    g13 = jnp.dot(hn, w13_ref[...], preferred_element_type=f32)
    g1 = g13[:, :hidden_dim]
    v3 = g13[:, hidden_dim:]
    ffn = jnp.dot(g1 * jax.nn.sigmoid(g1) * v3, w2_ref[...],
                  preferred_element_type=f32)

    out_ref[...] = h + ffn


def encoder_block(x, params, cos, sin, cache_k, cache_v, *, start_pos):
    """cos/sin: (S, head_dim//2) tables for positions [start_pos, start_pos+S).
    cache_k/cache_v: flat (B, >=start_pos+S, n_kv_heads*head_dim) KV caches.
    Returns (out, updated_cache_k, updated_cache_v)."""
    B, S, D = x.shape
    P = start_pos
    T = P + S
    M = B * S
    Fk = N_KV_HEADS * HEAD_DIM
    assert cache_k.shape[1] >= T and cache_v.shape[1] >= T

    # Fused projection weights (3 Q/K/V matmuls -> 1, 2 FFN-in matmuls -> 1).
    wqkv = jnp.concatenate([params['wq'], params['wk'], params['wv']], axis=1)
    w13 = jnp.concatenate([params['w1'], params['w3']], axis=1)

    # Pair-duplicated cos and sign-masked sin tables so in-kernel RoPE is just
    # two lane shifts + FMAs (no iota / modulo / compare / select).
    cos2 = jnp.repeat(cos, 2, axis=-1)                  # (S, hd)
    sin2 = jnp.repeat(sin, 2, axis=-1)
    even = (jnp.arange(HEAD_DIM) % 2) == 0
    sin_a = jnp.where(even, -sin2, 0.0)
    sin_b = jnp.where(even, 0.0, sin2)

    def tiled(t, n_h):                                  # (S, hd) -> (B*S, n_h*hd)
        return jnp.tile(t, (B, n_h))

    cos_q, sina_q, sinb_q = (tiled(t, N_HEADS) for t in (cos2, sin_a, sin_b))
    cos_k, sina_k, sinb_k = (tiled(t, N_KV_HEADS) for t in (cos2, sin_a, sin_b))

    x2 = x.reshape(M, D)                                # flatten once, host side
    if P > 0:
        ck_old = cache_k[:, :P, :]                      # only the needed prefix
        cv_old = cache_v[:, :P, :]
    else:                                               # dummies (never read)
        ck_old = jnp.zeros((B, 1, Fk), jnp.float32)
        cv_old = jnp.zeros((B, 1, Fk), jnp.float32)

    kern = functools.partial(
        encoder_block_kernel,
        B=B, S=S, P=P, n_heads=N_HEADS, n_kv_heads=N_KV_HEADS,
        head_dim=HEAD_DIM, hidden_dim=HIDDEN_DIM, eps=NORM_EPS,
    )
    vmem = pl.BlockSpec(memory_space=pltpu.MemorySpace.VMEM)
    # Gridless single invocation: total footprint is far under the VMEM limit on
    # v5e/v6e/v7x, so tiling / a batch grid would only add per-step overhead at
    # this size (add grid=(B,) with "parallel" semantics only if B*S grows).
    out2, new_k, new_v = pl.pallas_call(
        kern,
        in_specs=[vmem] * 15,
        out_specs=(vmem, vmem, vmem),
        out_shape=(
            jax.ShapeDtypeStruct((M, D), jnp.float32),
            jax.ShapeDtypeStruct((M, Fk), jnp.float32),
            jax.ShapeDtypeStruct((M, Fk), jnp.float32),
        ),
    )(x2, wqkv, params['wo'], w13, params['w2'],
      params['attn_norm'], params['ffn_norm'],
      cos_q, sina_q, sinb_q, cos_k, sina_k, sinb_k,
      ck_old, cv_old)

    out = out2.reshape(B, S, D)
    # Splice the O(S) new slice into the caller's cache.  Done outside the
    # kernel (in place under donation) instead of via aliased partial writes,
    # so the kernel itself never reads or writes the full O(T) cache.
    cache_k = jax.lax.dynamic_update_slice(cache_k, new_k.reshape(B, S, Fk),
                                           (0, P, 0))
    cache_v = jax.lax.dynamic_update_slice(cache_v, new_v.reshape(B, S, Fk),
                                           (0, P, 0))
    return out, cache_k, cache_v


# ---------------------------------------------------------------------------
# Pure-JAX reference (matches the PyTorch semantics) for verification
# ---------------------------------------------------------------------------
def reference(x, params, cos, sin, cache_k, cache_v, *, start_pos):
    B, S, D = x.shape
    T = cache_k.shape[1]

    def rms(v, w):
        ms = jnp.mean(v * v, axis=-1, keepdims=True)
        return (v * jax.lax.rsqrt(ms + NORM_EPS)) * w

    def rope(v, n_h):
        vr = v.reshape(B, S, n_h, HEAD_DIM // 2, 2)
        e, o = vr[..., 0], vr[..., 1]
        c = cos[None, :, None, :]
        s_ = sin[None, :, None, :]
        return jnp.stack([e * c - o * s_, e * s_ + o * c],
                         axis=-1).reshape(B, S, n_h * HEAD_DIM)

    h_in = rms(x, params['attn_norm'])
    xq = rope(h_in @ params['wq'], N_HEADS).reshape(B, S, N_HEADS, HEAD_DIM)
    xk = rope(h_in @ params['wk'], N_KV_HEADS).reshape(B, S, N_KV_HEADS, HEAD_DIM)
    xv = (h_in @ params['wv']).reshape(B, S, N_KV_HEADS, HEAD_DIM)

    ck = cache_k.reshape(B, T, N_KV_HEADS, HEAD_DIM)
    cv = cache_v.reshape(B, T, N_KV_HEADS, HEAD_DIM)
    keys4 = jax.lax.dynamic_update_slice(ck, xk, (0, start_pos, 0, 0))
    vals4 = jax.lax.dynamic_update_slice(cv, xv, (0, start_pos, 0, 0))
    keys = jnp.repeat(keys4[:, :start_pos + S], N_REP, axis=2)
    values = jnp.repeat(vals4[:, :start_pos + S], N_REP, axis=2)

    q = jnp.transpose(xq, (0, 2, 1, 3))
    k = jnp.transpose(keys, (0, 2, 1, 3))
    v = jnp.transpose(values, (0, 2, 1, 3))
    scores = jnp.einsum('bhsd,bhtd->bhst', q, k) / math.sqrt(HEAD_DIM)
    probs = jax.nn.softmax(scores, axis=-1)
    o = jnp.einsum('bhst,bhtd->bhsd', probs, v)
    o = jnp.transpose(o, (0, 2, 1, 3)).reshape(B, S, N_HEADS * HEAD_DIM)
    h = x + o @ params['wo']

    hn = rms(h, params['ffn_norm'])
    ffn = (jax.nn.silu(hn @ params['w1']) * (hn @ params['w3'])) @ params['w2']
    return h + ffn, keys4.reshape(B, T, -1), vals4.reshape(B, T, -1)


# ---------------------------------------------------------------------------
if __name__ == "__main__":
    key = jax.random.PRNGKey(0)
    ks = jax.random.split(key, 12)

    params = {
        'wq': 0.05 * jax.random.normal(ks[0], (DIM, N_HEADS * HEAD_DIM), jnp.float32),
        'wk': 0.05 * jax.random.normal(ks[1], (DIM, N_KV_HEADS * HEAD_DIM), jnp.float32),
        'wv': 0.05 * jax.random.normal(ks[2], (DIM, N_KV_HEADS * HEAD_DIM), jnp.float32),
        'wo': 0.05 * jax.random.normal(ks[3], (N_HEADS * HEAD_DIM, DIM), jnp.float32),
        'w1': 0.05 * jax.random.normal(ks[4], (DIM, HIDDEN_DIM), jnp.float32),
        'w2': 0.05 * jax.random.normal(ks[5], (HIDDEN_DIM, DIM), jnp.float32),
        'w3': 0.05 * jax.random.normal(ks[6], (DIM, HIDDEN_DIM), jnp.float32),
        'attn_norm': 1.0 + 0.1 * jax.random.normal(ks[10], (1, DIM), jnp.float32),
        'ffn_norm': 1.0 + 0.1 * jax.random.normal(ks[11], (1, DIM), jnp.float32),
    }

    x = jax.random.normal(ks[7], (BATCH, SEQ, DIM), jnp.float32)

    # Rotary frequencies, sliced at [start_pos : start_pos + seq_len].
    theta = 10000.0 ** (-jnp.arange(0, HEAD_DIM, 2, dtype=jnp.float32) / HEAD_DIM)
    pos = jnp.arange(START_POS, START_POS + SEQ, dtype=jnp.float32)
    angles = jnp.outer(pos, theta)                       # (S, head_dim // 2)
    cos_f, sin_f = jnp.cos(angles), jnp.sin(angles)

    # KV cache prefix [0:START_POS] holds "previous" keys/values (flat layout).
    cache_k = 0.1 * jax.random.normal(ks[8], (BATCH, TOTAL, N_KV_HEADS * HEAD_DIM),
                                      jnp.float32)
    cache_v = 0.1 * jax.random.normal(ks[9], (BATCH, TOTAL, N_KV_HEADS * HEAD_DIM),
                                      jnp.float32)

    out, new_k, new_v = encoder_block(x, params, cos_f, sin_f, cache_k, cache_v,
                                      start_pos=START_POS)
    out = jax.block_until_ready(out)

    ref_out, ref_k, ref_v = reference(x, params, cos_f, sin_f, cache_k, cache_v,
                                      start_pos=START_POS)
    assert jnp.allclose(out, ref_out, atol=2e-2, rtol=2e-2), \
        f"out max abs err {jnp.max(jnp.abs(out - ref_out))}"
    assert jnp.allclose(new_k, ref_k, atol=2e-2, rtol=2e-2), \
        f"cache_k max abs err {jnp.max(jnp.abs(new_k - ref_k))}"
    assert jnp.allclose(new_v, ref_v, atol=2e-2, rtol=2e-2), \
        f"cache_v max abs err {jnp.max(jnp.abs(new_v - ref_v))}"

    print("KERNEL_OK")
</pallas_src>

<mosaic_0001>
module attributes {stable_mosaic.version = 11 : i64} {
  func.func @encoder_block_kernel(%arg0: memref<16x64xf32, #tpu.memory_space<vmem>>, %arg1: memref<64x128xf32, #tpu.memory_space<vmem>>, %arg2: memref<64x64xf32, #tpu.memory_space<vmem>>, %arg3: memref<64x512xf32, #tpu.memory_space<vmem>>, %arg4: memref<256x64xf32, #tpu.memory_space<vmem>>, %arg5: memref<1x64xf32, #tpu.memory_space<vmem>>, %arg6: memref<1x64xf32, #tpu.memory_space<vmem>>, %arg7: memref<16x64xf32, #tpu.memory_space<vmem>>, %arg8: memref<16x64xf32, #tpu.memory_space<vmem>>, %arg9: memref<16x64xf32, #tpu.memory_space<vmem>>, %arg10: memref<16x32xf32, #tpu.memory_space<vmem>>, %arg11: memref<16x32xf32, #tpu.memory_space<vmem>>, %arg12: memref<16x32xf32, #tpu.memory_space<vmem>>, %arg13: memref<2x8x32xf32, #tpu.memory_space<vmem>>, %arg14: memref<2x8x32xf32, #tpu.memory_space<vmem>>, %arg15: memref<16x64xf32, #tpu.memory_space<vmem>>, %arg16: memref<16x32xf32, #tpu.memory_space<vmem>>, %arg17: memref<16x32xf32, #tpu.memory_space<vmem>>) attributes {dimension_semantics = [], scalar_prefetch = 0 : i64, scratch_operands = 0 : i64, tpu.core_type = #tpu.core_type<tc>} {
    %c0 = arith.constant 0 : index
    %c0_0 = arith.constant 0 : index
    %0 = vector.load %arg0[%c0, %c0_0] : memref<16x64xf32, #tpu.memory_space<vmem>>, vector<16x64xf32>
    %c0_1 = arith.constant 0 : index
    %c0_2 = arith.constant 0 : index
    %1 = vector.load %arg5[%c0_1, %c0_2] : memref<1x64xf32, #tpu.memory_space<vmem>>, vector<1x64xf32>
    %2 = arith.mulf %0, %0 : vector<16x64xf32>
    %cst = arith.constant dense<0.000000e+00> : vector<16xf32>
    %3 = vector.multi_reduction <add>, %2, %cst [1] : vector<16x64xf32> to vector<16xf32>
    %4 = vector.shape_cast %3 : vector<16xf32> to vector<16x1xf32>
    %cst_3 = arith.constant 6.400000e+01 : f32
    %5 = vector.broadcast %cst_3 : f32 to vector<16x1xf32>
    %6 = arith.divf %4, %5 : vector<16x1xf32>
    %cst_4 = arith.constant 9.99999974E-6 : f32
    %7 = vector.broadcast %cst_4 : f32 to vector<16x1xf32>
    %8 = arith.addf %6, %7 : vector<16x1xf32>
    %9 = math.rsqrt %8 : vector<16x1xf32>
    %10 = vector.broadcast %9 : vector<16x1xf32> to vector<16x64xf32>
    %11 = arith.mulf %0, %10 : vector<16x64xf32>
    %12 = vector.broadcast %1 : vector<1x64xf32> to vector<16x64xf32>
    %13 = arith.mulf %11, %12 : vector<16x64xf32>
    %c0_5 = arith.constant 0 : index
    %c0_6 = arith.constant 0 : index
    %14 = vector.load %arg1[%c0_5, %c0_6] : memref<64x128xf32, #tpu.memory_space<vmem>>, vector<64x128xf32>
    %cst_7 = arith.constant dense<0.000000e+00> : vector<16x128xf32>
    %15 = tpu.matmul %13, %14, %cst_7 {dimension_numbers = #tpu.dot_dimension_numbers<[1], [0], [0], [1], [0, 0, 1, 1], [], []>} : vector<16x64xf32>, vector<64x128xf32>, vector<16x128xf32> -> vector<16x128xf32>
    %16 = vector.extract_strided_slice %15 {offsets = [0, 0], sizes = [16, 64], strides = [1, 1]} : vector<16x128xf32> to vector<16x64xf32>
    %c0_8 = arith.constant 0 : index
    %c0_9 = arith.constant 0 : index
    %17 = vector.load %arg7[%c0_8, %c0_9] : memref<16x64xf32, #tpu.memory_space<vmem>>, vector<16x64xf32>
    %c0_10 = arith.constant 0 : index
    %c0_11 = arith.constant 0 : index
    %18 = vector.load %arg8[%c0_10, %c0_11] : memref<16x64xf32, #tpu.memory_space<vmem>>, vector<16x64xf32>
    %c0_12 = arith.constant 0 : index
    %c0_13 = arith.constant 0 : index
    %19 = vector.load %arg9[%c0_12, %c0_13] : memref<16x64xf32, #tpu.memory_space<vmem>>, vector<16x64xf32>
    %20 = arith.mulf %16, %17 : vector<16x64xf32>
    %21 = vector.extract_strided_slice %16 {offsets = [0, 1], sizes = [16, 63], strides = [1, 1]} : vector<16x64xf32> to vector<16x63xf32>
    %22 = vector.extract_strided_slice %16 {offsets = [0, 0], sizes = [16, 1], strides = [1, 1]} : vector<16x64xf32> to vector<16x1xf32>
    %23 = tpu.concatenate %21, %22 in 1 : vector<16x63xf32>, vector<16x1xf32> -> vector<16x64xf32>
    %24 = arith.mulf %23, %18 : vector<16x64xf32>
    %25 = arith.addf %20, %24 : vector<16x64xf32>
    %26 = vector.extract_strided_slice %16 {offsets = [0, 63], sizes = [16, 1], strides = [1, 1]} : vector<16x64xf32> to vector<16x1xf32>
    %27 = vector.extract_strided_slice %16 {offsets = [0, 0], sizes = [16, 63], strides = [1, 1]} : vector<16x64xf32> to vector<16x63xf32>
    %28 = tpu.concatenate %26, %27 in 1 : vector<16x1xf32>, vector<16x63xf32> -> vector<16x64xf32>
    %29 = arith.mulf %28, %19 : vector<16x64xf32>
    %30 = arith.addf %25, %29 : vector<16x64xf32>
    %31 = vector.extract_strided_slice %15 {offsets = [0, 64], sizes = [16, 32], strides = [1, 1]} : vector<16x128xf32> to vector<16x32xf32>
    %c0_14 = arith.constant 0 : index
    %c0_15 = arith.constant 0 : index
    %32 = vector.load %arg10[%c0_14, %c0_15] : memref<16x32xf32, #tpu.memory_space<vmem>>, vector<16x32xf32>
    %c0_16 = arith.constant 0 : index
    %c0_17 = arith.constant 0 : index
    %33 = vector.load %arg11[%c0_16, %c0_17] : memref<16x32xf32, #tpu.memory_space<vmem>>, vector<16x32xf32>
    %c0_18 = arith.constant 0 : index
    %c0_19 = arith.constant 0 : index
    %34 = vector.load %arg12[%c0_18, %c0_19] : memref<16x32xf32, #tpu.memory_space<vmem>>, vector<16x32xf32>
    %35 = arith.mulf %31, %32 : vector<16x32xf32>
    %36 = vector.extract_strided_slice %31 {offsets = [0, 1], sizes = [16, 31], strides = [1, 1]} : vector<16x32xf32> to vector<16x31xf32>
    %37 = vector.extract_strided_slice %31 {offsets = [0, 0], sizes = [16, 1], strides = [1, 1]} : vector<16x32xf32> to vector<16x1xf32>
    %38 = tpu.concatenate %36, %37 in 1 : vector<16x31xf32>, vector<16x1xf32> -> vector<16x32xf32>
    %39 = arith.mulf %38, %33 : vector<16x32xf32>
    %40 = arith.addf %35, %39 : vector<16x32xf32>
    %41 = vector.extract_strided_slice %31 {offsets = [0, 31], sizes = [16, 1], strides = [1, 1]} : vector<16x32xf32> to vector<16x1xf32>
    %42 = vector.extract_strided_slice %31 {offsets = [0, 0], sizes = [16, 31], strides = [1, 1]} : vector<16x32xf32> to vector<16x31xf32>
    %43 = tpu.concatenate %41, %42 in 1 : vector<16x1xf32>, vector<16x31xf32> -> vector<16x32xf32>
    %44 = arith.mulf %43, %34 : vector<16x32xf32>
    %45 = arith.addf %40, %44 : vector<16x32xf32>
    %46 = vector.extract_strided_slice %15 {offsets = [0, 96], sizes = [16, 32], strides = [1, 1]} : vector<16x128xf32> to vector<16x32xf32>
    %c0_20 = arith.constant 0 : index
    %c0_21 = arith.constant 0 : index
    %47 = vector.load %arg16[%c0_20, %c0_21] : memref<16x32xf32, #tpu.memory_space<vmem>>, vector<16x32xf32>
    tpu.vector_store %arg16[%c0_20, %c0_21], %45 {strides = array<i32>} : memref<16x32xf32, #tpu.memory_space<vmem>>, vector<16x32xf32>,
    %c0_22 = arith.constant 0 : index
    %c0_23 = arith.constant 0 : index
    %48 = vector.load %arg17[%c0_22, %c0_23] : memref<16x32xf32, #tpu.memory_space<vmem>>, vector<16x32xf32>
    tpu.vector_store %arg17[%c0_22, %c0_23], %46 {strides = array<i32>} : memref<16x32xf32, #tpu.memory_space<vmem>>, vector<16x32xf32>,
    %49 = vector.shape_cast %45 : vector<16x32xf32> to vector<2x8x32xf32>
    %50 = vector.shape_cast %46 : vector<16x32xf32> to vector<2x8x32xf32>
    %c0_24 = arith.constant 0 : index
    %c0_25 = arith.constant 0 : index
    %c0_26 = arith.constant 0 : index
    %51 = vector.load %arg13[%c0_24, %c0_25, %c0_26] : memref<2x8x32xf32, #tpu.memory_space<vmem>>, vector<2x8x32xf32>
    %52 = tpu.concatenate %51, %49 in 1 : vector<2x8x32xf32>, vector<2x8x32xf32> -> vector<2x16x32xf32>
    %c0_27 = arith.constant 0 : index
    %c0_28 = arith.constant 0 : index
    %c0_29 = arith.constant 0 : index
    %53 = vector.load %arg14[%c0_27, %c0_28, %c0_29] : memref<2x8x32xf32, #tpu.memory_space<vmem>>, vector<2x8x32xf32>
    %54 = tpu.concatenate %53, %50 in 1 : vector<2x8x32xf32>, vector<2x8x32xf32> -> vector<2x16x32xf32>
    %55 = vector.shape_cast %30 : vector<16x64xf32> to vector<2x8x64xf32>
    %56 = vector.extract_strided_slice %55 {offsets = [0, 0, 0], sizes = [2, 8, 16], strides = [1, 1, 1]} : vector<2x8x64xf32> to vector<2x8x16xf32>
    %57 = vector.extract_strided_slice %55 {offsets = [0, 0, 16], sizes = [2, 8, 16], strides = [1, 1, 1]} : vector<2x8x64xf32> to vector<2x8x16xf32>
    %58 = tpu.concatenate %56, %57 in 1 : vector<2x8x16xf32>, vector<2x8x16xf32> -> vector<2x16x16xf32>
    %59 = vector.extract_strided_slice %52 {offsets = [0, 0, 0], sizes = [2, 16, 16], strides = [1, 1, 1]} : vector<2x16x32xf32> to vector<2x16x16xf32>
    %60 = vector.extract_strided_slice %54 {offsets = [0, 0, 0], sizes = [2, 16, 16], strides = [1, 1, 1]} : vector<2x16x32xf32> to vector<2x16x16xf32>
    %61 = vector.extract_strided_slice %55 {offsets = [0, 0, 32], sizes = [2, 8, 16], strides = [1, 1, 1]} : vector<2x8x64xf32> to vector<2x8x16xf32>
    %62 = vector.extract_strided_slice %55 {offsets = [0, 0, 48], sizes = [2, 8, 16], strides = [1, 1, 1]} : vector<2x8x64xf32> to vector<2x8x16xf32>
    %63 = tpu.concatenate %61, %62 in 1 : vector<2x8x16xf32>, vector<2x8x16xf32> -> vector<2x16x16xf32>
    %64 = vector.extract_strided_slice %52 {offsets = [0, 0, 16], sizes = [2, 16, 16], strides = [1, 1, 1]} : vector<2x16x32xf32> to vector<2x16x16xf32>
    %65 = vector.extract_strided_slice %54 {offsets = [0, 0, 16], sizes = [2, 16, 16], strides = [1, 1, 1]} : vector<2x16x32xf32> to vector<2x16x16xf32>
    %66 = tpu.concatenate %58, %63 in 0 : vector<2x16x16xf32>, vector<2x16x16xf32> -> vector<4x16x16xf32>
    %67 = tpu.concatenate %59, %64 in 0 : vector<2x16x16xf32>, vector<2x16x16xf32> -> vector<4x16x16xf32>
    %68 = tpu.concatenate %60, %65 in 0 : vector<2x16x16xf32>, vector<2x16x16xf32> -> vector<4x16x16xf32>
    "tpu.trace_start"() <{level = 10 : i32, message = "gsd,gtd->gst"}> : () -> ()
    %cst_30 = arith.constant dense<0.000000e+00> : vector<4x16x16xf32>
    %69 = tpu.matmul %66, %67, %cst_30 {dimension_numbers = #tpu.dot_dimension_numbers<[2], [2], [1], [1], [0, 0, 0, 1, 1, 1], [0], [0]>} : vector<4x16x16xf32>, vector<4x16x16xf32>, vector<4x16x16xf32> -> vector<4x16x16xf32>
    "tpu.trace_stop"() : () -> ()
    %cst_31 = arith.constant 2.500000e-01 : f32
    %70 = vector.broadcast %cst_31 : f32 to vector<4x16x16xf32>
    %71 = arith.mulf %69, %70 : vector<4x16x16xf32>
    %cst_32 = arith.constant dense<0xFF800000> : vector<4x16xf32>
    %72 = vector.multi_reduction <maximumf>, %71, %cst_32 [2] : vector<4x16x16xf32> to vector<4x16xf32>
    %cst_33 = arith.constant 0xFF800000 : f32
    %73 = vector.broadcast %cst_33 : f32 to vector<4x16xf32>
    %74 = arith.maximumf %73, %72 : vector<4x16xf32>
    %75 = vector.shape_cast %74 : vector<4x16xf32> to vector<4x16x1xf32>
    %76 = vector.broadcast %75 : vector<4x16x1xf32> to vector<4x16x16xf32>
    %77 = arith.subf %71, %76 : vector<4x16x16xf32>
    %78 = math.exp %77 : vector<4x16x16xf32>
    %cst_34 = arith.constant dense<0.000000e+00> : vector<4x16xf32>
    %79 = vector.multi_reduction <add>, %78, %cst_34 [2] : vector<4x16x16xf32> to vector<4x16xf32>
    %80 = vector.shape_cast %79 : vector<4x16xf32> to vector<4x16x1xf32>
    %81 = vector.broadcast %80 : vector<4x16x1xf32> to vector<4x16x16xf32>
    %82 = arith.divf %78, %81 : vector<4x16x16xf32>
    "tpu.trace_start"() <{level = 10 : i32, message = "gst,gtd->gsd"}> : () -> ()
    %cst_35 = arith.constant dense<0.000000e+00> : vector<4x16x16xf32>
    %83 = tpu.matmul %82, %68, %cst_35 {dimension_numbers = #tpu.dot_dimension_numbers<[2], [1], [1], [2], [0, 0, 0, 1, 1, 2], [0], [0]>} : vector<4x16x16xf32>, vector<4x16x16xf32>, vector<4x16x16xf32> -> vector<4x16x16xf32>
    "tpu.trace_stop"() : () -> ()
    %84 = vector.extract_strided_slice %83 {offsets = [0, 0, 0], sizes = [2, 16, 16], strides = [1, 1, 1]} : vector<4x16x16xf32> to vector<2x16x16xf32>
    %85 = vector.extract_strided_slice %84 {offsets = [0, 0, 0], sizes = [2, 8, 16], strides = [1, 1, 1]} : vector<2x16x16xf32> to vector<2x8x16xf32>
    %86 = vector.extract_strided_slice %84 {offsets = [0, 8, 0], sizes = [2, 8, 16], strides = [1, 1, 1]} : vector<2x16x16xf32> to vector<2x8x16xf32>
    %87 = vector.extract_strided_slice %83 {offsets = [2, 0, 0], sizes = [2, 16, 16], strides = [1, 1, 1]} : vector<4x16x16xf32> to vector<2x16x16xf32>
    %88 = vector.extract_strided_slice %87 {offsets = [0, 0, 0], sizes = [2, 8, 16], strides = [1, 1, 1]} : vector<2x16x16xf32> to vector<2x8x16xf32>
    %89 = vector.extract_strided_slice %87 {offsets = [0, 8, 0], sizes = [2, 8, 16], strides = [1, 1, 1]} : vector<2x16x16xf32> to vector<2x8x16xf32>
    %90 = tpu.concatenate %85, %86, %88, %89 in 2 : vector<2x8x16xf32>, vector<2x8x16xf32>, vector<2x8x16xf32>, vector<2x8x16xf32> -> vector<2x8x64xf32>
    %91 = vector.shape_cast %90 : vector<2x8x64xf32> to vector<16x64xf32>
    %c0_36 = arith.constant 0 : index
    %c0_37 = arith.constant 0 : index
    %92 = vector.load %arg2[%c0_36, %c0_37] : memref<64x64xf32, #tpu.memory_space<vmem>>, vector<64x64xf32>
    %cst_38 = arith.constant dense<0.000000e+00> : vector<16x64xf32>
    %93 = tpu.matmul %91, %92, %cst_38 {dimension_numbers = #tpu.dot_dimension_numbers<[1], [0], [0], [1], [0, 0, 1, 1], [], []>} : vector<16x64xf32>, vector<64x64xf32>, vector<16x64xf32> -> vector<16x64xf32>
    %94 = arith.addf %0, %93 : vector<16x64xf32>
    %c0_39 = arith.constant 0 : index
    %c0_40 = arith.constant 0 : index
    %95 = vector.load %arg6[%c0_39, %c0_40] : memref<1x64xf32, #tpu.memory_space<vmem>>, vector<1x64xf32>
    %96 = arith.mulf %94, %94 : vector<16x64xf32>
    %cst_41 = arith.constant dense<0.000000e+00> : vector<16xf32>
    %97 = vector.multi_reduction <add>, %96, %cst_41 [1] : vector<16x64xf32> to vector<16xf32>
    %98 = vector.shape_cast %97 : vector<16xf32> to vector<16x1xf32>
    %cst_42 = arith.constant 6.400000e+01 : f32
    %99 = vector.broadcast %cst_42 : f32 to vector<16x1xf32>
    %100 = arith.divf %98, %99 : vector<16x1xf32>
    %cst_43 = arith.constant 9.99999974E-6 : f32
    %101 = vector.broadcast %cst_43 : f32 to vector<16x1xf32>
    %102 = arith.addf %100, %101 : vector<16x1xf32>
    %103 = math.rsqrt %102 : vector<16x1xf32>
    %104 = vector.broadcast %103 : vector<16x1xf32> to vector<16x64xf32>
    %105 = arith.mulf %94, %104 : vector<16x64xf32>
    %106 = vector.broadcast %95 : vector<1x64xf32> to vector<16x64xf32>
    %107 = arith.mulf %105, %106 : vector<16x64xf32>
    %c0_44 = arith.constant 0 : index
    %c0_45 = arith.constant 0 : index
    %108 = vector.load %arg3[%c0_44, %c0_45] : memref<64x512xf32, #tpu.memory_space<vmem>>, vector<64x512xf32>
    %cst_46 = arith.constant dense<0.000000e+00> : vector<16x512xf32>
    %109 = tpu.matmul %107, %108, %cst_46 {dimension_numbers = #tpu.dot_dimension_numbers<[1], [0], [0], [1], [0, 0, 1, 1], [], []>} : vector<16x64xf32>, vector<64x512xf32>, vector<16x512xf32> -> vector<16x512xf32>
    %110 = vector.extract_strided_slice %109 {offsets = [0, 0], sizes = [16, 256], strides = [1, 1]} : vector<16x512xf32> to vector<16x256xf32>
    %111 = vector.extract_strided_slice %109 {offsets = [0, 256], sizes = [16, 256], strides = [1, 1]} : vector<16x512xf32> to vector<16x256xf32>
    %112 = arith.negf %110 : vector<16x256xf32>
    %113 = math.exp %112 : vector<16x256xf32>
    %cst_47 = arith.constant 1.000000e+00 : f32
    %114 = vector.broadcast %cst_47 : f32 to vector<16x256xf32>
    %115 = arith.addf %114, %113 : vector<16x256xf32>
    %116 = arith.divf %114, %115 : vector<16x256xf32>
    %117 = arith.mulf %110, %116 : vector<16x256xf32>
    %118 = arith.mulf %117, %111 : vector<16x256xf32>
    %c0_48 = arith.constant 0 : index
    %c0_49 = arith.constant 0 : index
    %119 = vector.load %arg4[%c0_48, %c0_49] : memref<256x64xf32, #tpu.memory_space<vmem>>, vector<256x64xf32>
    %cst_50 = arith.constant dense<0.000000e+00> : vector<16x64xf32>
    %120 = tpu.matmul %118, %119, %cst_50 {dimension_numbers = #tpu.dot_dimension_numbers<[1], [0], [0], [1], [0, 0, 1, 1], [], []>} : vector<16x256xf32>, vector<256x64xf32>, vector<16x64xf32> -> vector<16x64xf32>
    %121 = arith.addf %94, %120 : vector<16x64xf32>
    %c0_51 = arith.constant 0 : index
    %c0_52 = arith.constant 0 : index
    %122 = vector.load %arg15[%c0_51, %c0_52] : memref<16x64xf32, #tpu.memory_space<vmem>>, vector<16x64xf32>
    tpu.vector_store %arg15[%c0_51, %c0_52], %121 {strides = array<i32>} : memref<16x64xf32, #tpu.memory_space<vmem>>, vector<16x64xf32>,
    return
  }
}

</mosaic_0001>

<bundles_post_ra>
// kernel: tpu_custom_call.1
= control target key start
LH: loop header
LB: loop body
LE: loop exit
PB: predicated region body
PF: predicated region fallthrough
CT: control target
= control target key end

     0   :  { %s3075_s0 = inlined_call_operand.hbm [shape: f32[16,64], index: 0, kind: input, shape index: {}]   ;;  %s3076_s1 = inlined_call_operand.vmem [shape: f32[64,128], index: 1, kind: input, shape index: {}]   ;;  %s3077_s2 = inlined_call_operand.vmem [shape: f32[64,64], index: 2, kind: input, shape index: {}]   ;;  %s3078_s3 = inlined_call_operand.vmem [shape: f32[64,512], index: 3, kind: input, shape index: {}]   ;;  %s3079_s4 = inlined_call_operand.vmem [shape: f32[256,64], index: 4, kind: input, shape index: {}]   ;;  %s3080_s5 = inlined_call_operand.vmem [shape: f32[1,64], index: 5, kind: input, shape index: {}]   ;;  %s3081_s6 = inlined_call_operand.vmem [shape: f32[1,64], index: 6, kind: input, shape index: {}]   ;;  %s3082_s7 = inlined_call_operand.vmem [shape: f32[16,64], index: 7, kind: input, shape index: {}]   ;;  %s3083_s8 = inlined_call_operand.hbm [shape: f32[16,64], index: 8, kind: input, shape index: {}]   ;;  %s3084_s9 = inlined_call_operand.hbm [shape: f32[16,64], index: 9, kind: input, shape index: {}]   ;;  %s3085_s10 = inlined_call_operand.vmem [shape: f32[16,32], index: 10, kind: input, shape index: {}]   ;;  %s3086_s11 = inlined_call_operand.hbm [shape: f32[16,32], index: 11, kind: input, shape index: {}]   ;;  %s3087_s12 = inlined_call_operand.hbm [shape: f32[16,32], index: 12, kind: input, shape index: {}]   ;;  %s3088_s13 = inlined_call_operand.hbm [shape: f32[2,8,32], index: 13, kind: input, shape index: {}]   ;;  %s3089_s14 = inlined_call_operand.vmem [shape: f32[2,8,32], index: 14, kind: input, shape index: {}]   ;;  %s3090_s15 = inlined_call_operand.hbm [shape: f32[16,64], index: 15, kind: output, shape index: {0}]   ;;  %s3091_s16 = inlined_call_operand.hbm [shape: f32[16,32], index: 16, kind: output, shape index: {1}]   ;;  %s3092_s17 = inlined_call_operand.hbm [shape: f32[16,32], index: 17, kind: output, shape index: {2}]  }
   0x1   :  { %3096 = sst [smem:[#allocation23_spill]] %s3075_s0 }
   0x2   :  { %3097 = sst [smem:[#allocation24_spill]] %s3076_s1 }
   0x3   :  { %3098 = sst [smem:[#allocation25_spill]] %s3090_s15 }
   0x4   :  { %23 = vsyncpa [#allocation3], 0 }
   0x5   :  { %24 = vsyncpa [#allocation6], 0 }
   0x6   :  { %25 = vsyncpa [#allocation9], 0 }
   0x7   :  { %26 = vsyncpa [#allocation12], 0 }
   0x8   :  { %27 = vsyncpa [#allocation4], 0 }
   0x9   :  { %28 = vsyncpa [#allocation15], 0  ;;  %s2375_s24 = smov [#allocation5]   ;;  %s2376_s26 = smov [#allocation8]  }
   0xa   :  { %s60_s25 = sshll.u32 %s2375_s24, 4  ;;  %s86_s27 = sshll.u32 %s2376_s26, 4  ;;  %s61_s25 = int_to_ptr.vmem [resolvable:$true] %s60_s25  ;;  %s2489_s27 = int_to_ptr.vmem [resolvable:$true] %s86_s27 }
   0xb   :  { %s2165_s0 = scalar_lea.hbm %s3083_s8, 256 }
   0xc   :  { %p2166_p0 = scmp.ne.s32.totalorder %s3083_s8, %s2165_s0  ;;  %p2169_p1 = scmp.lt.u32.totalorder %s2165_s0, %s3083_s8 }
   0xe   :  { %p2171_p2 = pnand %p2169_p1, %p2166_p0 }
  0x10   :  { %2174 = shalt.err (!%p2171_p2)
}
  0x11   :  { %s2175_s20 = scalar_lea.vmem %s61_s25, 256  ;;  %p2180_p4 = scmp.lt.s32.totalorder %s61_s25, %s61_s25 }
  0x12   :  { %p2176_p3 = scmp.ne.s32.totalorder %s61_s25, %s2175_s20  ;;  %p2181_p5 = scmp.lt.s32.totalorder %s2175_s20, %s2175_s20 }
  0x14   :  { %p2182_p6 = por %p2181_p5, %p2180_p4 }
  0x16   :  { %p2183_p7 = pnand %p2182_p6, %p2176_p3 }
  0x18   :  { %2186 = shalt.err (!%p2183_p7)
}
  0x19   :  { %s2377_s21 = smov 128   ;;  %s2378_s22 = smov 8  }
  0x1a   :  { %66 = dma.hbm_to_vmem [thread:$0]  %s3083_s8, 256, %s61_s25, [#allocation6], %s2377_s21, %s2377_s21, %s2378_s22  }
  0x1b   :  { %s2187_s29 = scalar_lea.hbm %s3086_s11, 256 }
  0x1c   :  { %p2188_p8 = scmp.ne.s32.totalorder %s3086_s11, %s2187_s29  ;;  %p2191_p9 = scmp.lt.u32.totalorder %s2187_s29, %s3086_s11 }
  0x1e   :  { %p2193_p10 = pnand %p2191_p9, %p2188_p8 }
  0x20   :  { %2196 = shalt.err (!%p2193_p10)
}
  0x21   :  { %s2197_s1 = scalar_lea.vmem %s2489_s27, 256  ;;  %p2202_p12 = scmp.lt.s32.totalorder %s2489_s27, %s2489_s27 }
  0x22   :  { %p2198_p11 = scmp.ne.s32.totalorder %s2489_s27, %s2197_s1  ;;  %p2203_p13 = scmp.lt.s32.totalorder %s2197_s1, %s2197_s1 }
  0x24   :  { %p2204_p0 = por %p2203_p13, %p2202_p12 }
  0x26   :  { %p2205_p1 = pnand %p2204_p0, %p2198_p11 }
  0x28   :  { %2208 = shalt.err (!%p2205_p1)
}
  0x29   :  { %92 = dma.hbm_to_vmem [thread:$0]  %s3086_s11, 256, %s2489_s27, [#allocation9], %s2377_s21, %s2377_s21, %s2378_s22  }
  0x2a   :  { %s2379_s20 = smov [#allocation2]   ;;  %s2380_s24 = smov [#allocation7]  }
  0x2b   :  { %s34_s23 = sshll.u32 %s2379_s20, 4  ;;  %s72_s26 = sshll.u32 %s2380_s24, 4  ;;  %s35_s23 = int_to_ptr.vmem [resolvable:$true] %s34_s23  ;;  %s2526_s26 = int_to_ptr.vmem [resolvable:$true] %s72_s26 }
  0x2c   :  { %s3099_s0 = sld [smem:[#allocation23_spill]] }
  0x32   :  { %s2209_s30 = scalar_lea.hbm %s3099_s0, 256 }
  0x33   :  { %p2210_p2 = scmp.ne.s32.totalorder %s3099_s0, %s2209_s30  ;;  %p2213_p3 = scmp.lt.u32.totalorder %s2209_s30, %s3099_s0 }
  0x35   :  { %p2215_p4 = pnand %p2213_p3, %p2210_p2 }
  0x37   :  { %2218 = shalt.err (!%p2215_p4)
}
  0x38   :  { %s2219_s11 = scalar_lea.vmem %s35_s23, 256  ;;  %p2224_p6 = scmp.lt.s32.totalorder %s35_s23, %s35_s23 }
  0x39   :  { %p2220_p5 = scmp.ne.s32.totalorder %s35_s23, %s2219_s11  ;;  %p2225_p7 = scmp.lt.s32.totalorder %s2219_s11, %s2219_s11 }
  0x3b   :  { %p2226_p8 = por %p2225_p7, %p2224_p6 }
  0x3d   :  { %p2227_p9 = pnand %p2226_p8, %p2220_p5 }
  0x3f   :  { %2230 = shalt.err (!%p2227_p9)
}
  0x40   :  { %40 = dma.hbm_to_vmem [thread:$0]  %s3099_s0, 256, %s35_s23, [#allocation3], %s2377_s21, %s2377_s21, %s2378_s22  }
  0x41   :  { %s2231_s15 = scalar_lea.hbm %s3084_s9, 256 }
  0x42   :  { %p2232_p10 = scmp.ne.s32.totalorder %s3084_s9, %s2231_s15  ;;  %p2235_p11 = scmp.lt.u32.totalorder %s2231_s15, %s3084_s9 }
  0x44   :  { %p2237_p12 = pnand %p2235_p11, %p2232_p10 }
  0x46   :  { %2240 = shalt.err (!%p2237_p12)
}
  0x47   :  { %s2241_s18 = scalar_lea.vmem %s2526_s26, 256  ;;  %p2246_p0 = scmp.lt.s32.totalorder %s2526_s26, %s2526_s26 }
  0x48   :  { %p2242_p13 = scmp.ne.s32.totalorder %s2526_s26, %s2241_s18  ;;  %p2247_p1 = scmp.lt.s32.totalorder %s2241_s18, %s2241_s18 }
  0x4a   :  { %p2248_p2 = por %p2247_p1, %p2246_p0 }
  0x4c   :  { %p2249_p3 = pnand %p2248_p2, %p2242_p13 }
  0x4e   :  { %2252 = shalt.err (!%p2249_p3)
}
  0x4f   :  { %78 = dma.hbm_to_vmem [thread:$0]  %s3084_s9, 256, %s2526_s26, [#allocation6], %s2377_s21, %s2377_s21, %s2378_s22  }
  0x50   :  { %s2381_s19 = smov [#allocation10]   ;;  %s2382_s11 = smov [#allocation11]  }
  0x51   :  { %s98_s1 = sshll.u32 %s2381_s19, 4  ;;  %s110_s27 = sshll.u32 %s2382_s11, 4  ;;  %s99_s1 = int_to_ptr.vmem [resolvable:$true] %s98_s1  ;;  %s2563_s27 = int_to_ptr.vmem [resolvable:$true] %s110_s27 }
  0x52   :  { %s2253_s20 = scalar_lea.hbm %s3087_s12, 256 }
  0x53   :  { %p2254_p4 = scmp.ne.s32.totalorder %s3087_s12, %s2253_s20  ;;  %p2257_p5 = scmp.lt.u32.totalorder %s2253_s20, %s3087_s12 }
  0x55   :  { %p2259_p6 = pnand %p2257_p5, %p2254_p4 }
  0x57   :  { %2262 = shalt.err (!%p2259_p6)
}
  0x58   :  { %s2263_s9 = scalar_lea.vmem %s99_s1, 256  ;;  %p2268_p8 = scmp.lt.s32.totalorder %s99_s1, %s99_s1 }
  0x59   :  { %p2264_p7 = scmp.ne.s32.totalorder %s99_s1, %s2263_s9  ;;  %p2269_p9 = scmp.lt.s32.totalorder %s2263_s9, %s2263_s9 }
  0x5b   :  { %p2270_p10 = por %p2269_p9, %p2268_p8 }
  0x5d   :  { %p2271_p11 = pnand %p2270_p10, %p2264_p7 }
  0x5f   :  { %2274 = shalt.err (!%p2271_p11)
}
  0x60   :  { %104 = dma.hbm_to_vmem [thread:$0]  %s3087_s12, 256, %s99_s1, [#allocation9], %s2377_s21, %s2377_s21, %s2378_s22  }
  0x61   :  { %s2275_s0 = scalar_lea.hbm %s3088_s13, 256 }
  0x62   :  { %p2276_p12 = scmp.ne.s32.totalorder %s3088_s13, %s2275_s0  ;;  %p2279_p13 = scmp.lt.u32.totalorder %s2275_s0, %s3088_s13 }
  0x64   :  { %p2281_p0 = pnand %p2279_p13, %p2276_p12 }
  0x66   :  { %2284 = shalt.err (!%p2281_p0)
}
  0x67   :  { %s2285_s20 = scalar_lea.vmem %s2563_s27, 256  ;;  %p2290_p2 = scmp.lt.s32.totalorder %s2563_s27, %s2563_s27 }
  0x68   :  { %p2286_p1 = scmp.ne.s32.totalorder %s2563_s27, %s2285_s20  ;;  %p2291_p3 = scmp.lt.s32.totalorder %s2285_s20, %s2285_s20 }
  0x6a   :  { %p2292_p4 = por %p2291_p3, %p2290_p2 }
  0x6c   :  { %p2293_p5 = pnand %p2292_p4, %p2286_p1 }
  0x6e   :  { %2296 = shalt.err (!%p2293_p5)
}
  0x6f   :  { %116 = dma.hbm_to_vmem [thread:$0]  %s3088_s13, 256, %s2563_s27, [#allocation12], %s2377_s21, %s2377_s21, %s2378_s22  }
  0x70   :  { %2363 = dma.done.wait [#allocation3], 256  }
  0x71   :  { %2364 = vsyncadd [#allocation3], 4294967040 }
  0x72   :  { %2365 = dma.done.wait [#allocation6], 512  }
  0x73   :  { %2366 = vsyncadd [#allocation6], 4294966784 }
  0x74   :  { %2367 = dma.done.wait [#allocation9], 512  }
  0x75   :  { %2368 = vsyncadd [#allocation9], 4294966784 }
  0x76   :  { %2369 = dma.done.wait [#allocation12], 256  }
  0x77   :  { %2370 = vsyncadd [#allocation12], 4294967040  ;;  %v2600_v0 = vld [vmem:[#allocation2] sm:$0xff]  ;;  %vm142_vm0 = vcmask 523264   ;;  %v2602_v1 = vld [vmem:[#allocation2 + $0x8] sm:$0xff]  ;;  %s3100_s15 = sld [smem:[#allocation24_spill]] }
  0x78   :  { %v140_v2 = vmul.f32 %v2600_v0, %v2600_v0  ;;  %v141_v3 = vmul.f32 %v2602_v1, %v2602_v1  ;;  %v1707_v25 = vld [vmem:[%s3080_s5] ss:$0 sm:$0xff]  ;;  %s2383_s13 = smov 95   ;;  %s2384_s27 = smov 63   ;;  %v304_v33 = vld [vmem:[%s3085_s10 + $0x8] sm:$0xff]  ;;  %vm325_vm1 = vcmask 252928  }
  0x79   :  { %s2385_s24 = smov 65   ;;  %s2386_s28 = smov 64   ;;  %v303_v34 = vld [vmem:[%s3085_s10] sm:$0xff]  ;;  %v306_v35 = vld [vmem:[#allocation8 + $0x8] sm:$0xff]  ;;  %v305_v42 = vld [vmem:[#allocation8] sm:$0xff]  ;;  %vm296_vm2 = vcmask 7168  }
  0x7a   :  { %v143_v4 = vsel %vm142_vm0, %v140_v2, 0.0  ;;  %v146_v5 = vsel %vm142_vm0, %v141_v3, 0.0  ;;  %s2387_s29 = smov 33   ;;  %v307_v47 = vld [vmem:[#allocation10] sm:$0xff]  ;;  %v308_v51 = vld [vmem:[#allocation10 + $0x8] sm:$0xff]  ;;  %s2388_s10 = smov 127  }
  0x7b   :  { %144 = vadd.xlane.f32.xlu0 %v143_v4  ;;  %s2389_s30 = smov 1   ;;  %vm277_vm3 = vcmask 515072   ;;  %v257_v3 = vld [vmem:[#allocation5] sm:$0xff]  ;;  %vm421_vm4 = vcmask 130048   ;;  %s2390_s11 = smov 112   ;;  %vm368_vm5 = vcmask 261120  }
  0x7c   :  { %vm2697_vm6 = vmpackc.low %vm421_vm4, %vm421_vm4  ;;  %s2392_s8 = smov 32   ;;  %s2393_s9 = smov 16   ;;  %vm1202_vm7 = vcmask 392192  }
  0x7d   :  { %v166_v6 = vld [vmem:[%s3100_s15] sm:$0xff]  ;;  %v167_v7 = vld [vmem:[%s3100_s15 + $0x8] sm:$0xff]  ;;  %v168_v9 = vld [vmem:[%s3100_s15 + $0x10] sm:$0xff] }
  0x7e   :  { %v1929_v8 = vpack.c.bf16 %v167_v7, %v166_v6  ;;  %v169_v10 = vld [vmem:[%s3100_s15 + $0x18] sm:$0xff]  ;;  %v170_v11 = vld [vmem:[%s3100_s15 + $0x20] sm:$0xff]  ;;  %v171_v13 = vld [vmem:[%s3100_s15 + $0x28] sm:$0xff] }
  0x7f   :  { %147 = vadd.xlane.f32.xlu0 %v146_v5  ;;  %v1933_v12 = vpack.c.bf16 %v169_v10, %v168_v9  ;;  %v1937_v14 = vpack.c.bf16 %v171_v13, %v170_v11  ;;  %v172_v15 = vld [vmem:[%s3100_s15 + $0x30] sm:$0xff]  ;;  %v173_v16 = vld [vmem:[%s3100_s15 + $0x38] sm:$0xff]  ;;  %v255_v7 = vld [vmem:[%s3082_s7] sm:$0xff] }
  0x80   :  { %1930 = vmatprep.subr.bf16.mxu0 %v1929_v8  ;;  %v1941_v17 = vpack.c.bf16 %v173_v16, %v172_v15  ;;  %v258_v10 = vld [vmem:[#allocation5 + $0x8] sm:$0xff]  ;;  %v259_v11 = vld [vmem:[#allocation7] sm:$0xff]  ;;  %v256_v15 = vld [vmem:[%s3082_s7 + $0x8] sm:$0xff]  ;;  %s2391_s7 = smov 96  }
  0x81   :  { %1932 = vmatpush3.bf16.msra.mxu0 %v1929_v8 }
  0x82   :  { %1934 = vmatprep.subr.bf16.mxu0 %v1933_v12 }
  0x85   :  { %1936 = vmatpush3.bf16.msra.mxu0 %v1933_v12 }
  0x86   :  { %1938 = vmatprep.subr.bf16.mxu0 %v1937_v14 }
  0x89   :  { %1940 = vmatpush3.bf16.msra.mxu0 %v1937_v14 }
  0x8a   :  { %1942 = vmatprep.subr.bf16.mxu0 %v1941_v17 }
  0x8d   :  { %1944 = vmatpush3.bf16.msra.mxu0 %v1941_v17 }
 0x108   :  { %v145_v18 = vpop.xlane.xlu0 %144 }
 0x109   :  { %v150_v19 = vmul.f32 0.015625, %v145_v18 }
 0x10b   :  { %v152_v20 = vadd.f32 1e-05, %v150_v19 }
 0x10c   :  { %v148_v21 = vpop.xlane.xlu0 %147 }
 0x10d   :  { %2109 = vrsqrt.f32 %v152_v20  ;;  %v151_v22 = vmul.f32 0.015625, %v148_v21  ;;  %v260_v21 = vld [vmem:[#allocation7 + $0x8] sm:$0xff] }
 0x10f   :  { %v153_v23 = vadd.f32 1e-05, %v151_v22 }
 0x111   :  { %2111 = vrsqrt.f32 %v153_v23 }
 0x117   :  { %v2110_v24 = vpop.eup %2109 }
 0x118   :  { %v156_v26 = vmul.f32 %v2110_v24, %v2600_v0 }
 0x11a   :  { %v164_v27 = vmul.f32 %v1707_v25, %v156_v26 }
 0x11b   :  { %v2112_v28 = vpop.eup %2111 }
 0x11c   :  { %v157_v29 = vmul.f32 %v2112_v28, %v2602_v1  ;;  %1851 = vmatprep.mubr.msk.f32.mxu0 %vm142_vm0, %v164_v27 }
 0x11e   :  { %v165_v30 = vmul.f32 %v1707_v25, %v157_v29  ;;  %v379_v29 = vld [vmem:[#allocation11] sm:$0xff] }
 0x120   :  { %1852 = vmatmul.mubr.msk.f32.vlgmr.msra.gmra.mrb[0].mxu0 %vm142_vm0, %v165_v30 }
 0x1f3   :  { %v2641_v31 = vpop.f32.mrb[0].mxu0 }
 0x1f4   :  { %321 = vrot.lane.b32.xlu1 %v2641_v31, %s2383_s13  ;;  %273 = vrot.lane.b32.xlu0 %v2641_v31, %s2384_s27  ;;  %v2645_v32 = vpop.f32.mrb[1].mxu0  ;;  %v262_v22 = vmul.f32 %v2641_v31, %v256_v15 }
 0x1f5   :  { %v261_v12 = vmul.f32 %v255_v7, %v2645_v32 }
 0x1f8   :  { %286 = vrot.lane.b32.xlu1 %v2641_v31, %s2385_s24  ;;  %313 = vrot.lane.b32.xlu0 %v304_v33, %s2386_s28 }
 0x1fc   :  { %271 = vrot.lane.b32.xlu1 %v2645_v32, %s2384_s27 }
 0x200   :  { %319 = vrot.lane.b32.xlu1 %v2645_v32, %s2383_s13 }
 0x204   :  { %284 = vrot.lane.b32.xlu1 %v2645_v32, %s2385_s24 }
 0x208   :  { %340 = vrot.lane.b32.xlu1 %v2645_v32, %s2387_s29 }
 0x20c   :  { %342 = vrot.lane.b32.xlu1 %v2641_v31, %s2387_s29 }
 0x210   :  { %311 = vrot.lane.b32.xlu1 %v303_v34, %s2386_s28 }
 0x266   :  { %v322_v36 = vpop.permute.xlu1 %321  ;;  %v274_v37 = vpop.permute.xlu0 %273 }
 0x267   :  { %v327_v38 = vsel %vm325_vm1, %v274_v37, %v322_v36  ;;  %v380_v36 = vld [vmem:[#allocation11 + $0x8] sm:$0xff] }
 0x268   :  { %v329_v39 = vmul.f32 %v327_v38, %v306_v35 }
 0x26a   :  { %v2661_v40 = vpop.permute.xlu1 %286  ;;  %334 = vrot.lane.b32.xlu0 %v329_v39, %s2386_s28  ;;  %v314_v56 = vpop.permute.xlu0 %313 }
 0x26b   :  { %v318_v62 = vmul.f32 %v2641_v31, %v314_v56 }
 0x26e   :  { %v272_v41 = vpop.permute.xlu1 %271 }
 0x272   :  { %v320_v43 = vpop.permute.xlu1 %319 }
 0x273   :  { %v326_v44 = vsel %vm325_vm1, %v272_v41, %v320_v43 }
 0x274   :  { %v328_v45 = vmul.f32 %v326_v44, %v305_v42 }
 0x276   :  { %332 = vrot.lane.b32.xlu1 %v328_v45, %s2386_s28  ;;  %v285_v46 = vpop.permute.xlu1 %284 }
 0x27a   :  { %v341_v48 = vpop.permute.xlu1 %340 }
 0x27b   :  { %v346_v49 = vsel %vm296_vm2, %v341_v48, %v285_v46 }
 0x27c   :  { %v348_v50 = vmul.f32 %v346_v49, %v307_v47 }
 0x27e   :  { %352 = vrot.lane.b32.xlu1 %v348_v50, %s2386_s28  ;;  %v343_v52 = vpop.permute.xlu1 %342 }
 0x27f   :  { %v347_v53 = vsel %vm296_vm2, %v343_v52, %v2661_v40 }
 0x280   :  { %v349_v54 = vmul.f32 %v347_v53, %v308_v51 }
 0x282   :  { %265 = vrot.lane.b32.xlu1 %v2645_v32, %s2388_s10  ;;  %354 = vrot.lane.b32.xlu0 %v349_v54, %s2386_s28  ;;  %v312_v55 = vpop.permute.xlu1 %311 }
 0x283   :  { %v317_v58 = vmul.f32 %v312_v55, %v2645_v32 }
 0x286   :  { %290 = vrot.lane.b32.xlu1 %v2645_v32, %s2389_s30  ;;  %267 = vrot.lane.b32.xlu0 %v2641_v31, %s2388_s10 }
 0x28a   :  { %292 = vrot.lane.b32.xlu0 %v2641_v31, %s2389_s30 }
 0x2dc   :  { %v335_v60 = vpop.permute.xlu0 %334 }
 0x2dd   :  { %v339_v2 = vadd.f32 %v335_v60, %v318_v62 }
 0x2e8   :  { %v333_v57 = vpop.permute.xlu1 %332 }
 0x2e9   :  { %v338_v59 = vadd.f32 %v333_v57, %v317_v58 }
 0x2f0   :  { %v353_v61 = vpop.permute.xlu1 %352 }
 0x2f1   :  { %v358_v63 = vadd.f32 %v353_v61, %v338_v59 }
 0x2f3   :  { %362 = vrot.lane.b32.xlu1 %v358_v63, %s2386_s28 }
 0x2f4   :  { %v355_v4 = vpop.permute.xlu0 %354  ;;  %v266_v5 = vpop.permute.xlu1 %265 }
 0x2f5   :  { %v359_v6 = vadd.f32 %v355_v4, %v339_v2  ;;  %v278_v8 = vsel %vm277_vm3, %v266_v5, %v272_v41 }
 0x2f6   :  { %v280_v9 = vmul.f32 %v278_v8, %v257_v3 }
 0x2f7   :  { %364 = vrot.lane.b32.xlu0 %v359_v6, %s2386_s28 }
 0x2f8   :  { %v268_v13 = vpop.permute.xlu0 %267  ;;  %v291_v14 = vpop.permute.xlu1 %290  ;;  %v282_v18 = vadd.f32 %v280_v9, %v261_v12 }
 0x2f9   :  { %v279_v16 = vsel %vm277_vm3, %v268_v13, %v274_v37  ;;  %v297_v17 = vsel %vm296_vm2, %v285_v46, %v291_v14 }
 0x2fa   :  { %v281_v19 = vmul.f32 %v279_v16, %v258_v10  ;;  %v299_v20 = vmul.f32 %v297_v17, %v259_v11 }
 0x2fc   :  { %v293_v23 = vpop.permute.xlu0 %292  ;;  %v301_v24 = vadd.f32 %v299_v20, %v282_v18  ;;  %v283_v26 = vadd.f32 %v281_v19, %v262_v22 }
 0x2fd   :  { %v298_v25 = vsel %vm296_vm2, %v2661_v40, %v293_v23 }
 0x2fe   :  { %v300_v27 = vmul.f32 %v298_v25, %v260_v21  ;;  %385 = vrot.lane.b32.xlu1 %v301_v24, %s2390_s11  ;;  %1858 = vmatprep.mubr.msk.f32.mxu0 %vm421_vm4, %v301_v24 }
 0x300   :  { %v302_v28 = vadd.f32 %v300_v27, %v283_v26 }
 0x302   :  { %387 = vrot.lane.b32.xlu0 %v302_v28, %s2390_s11  ;;  %1865 = vmatprep.mubr.msk.f32.mxu1 %vm421_vm4, %v302_v28 }
 0x365   :  { %v363_v30 = vpop.permute.xlu1 %362 }
 0x366   :  { %v1945_v34 = vpack.c.bf16 %v363_v30, %v379_v29  ;;  %v2089_v35 = vpack.i.bf16 %v363_v30, %v379_v29  ;;  %369 = vst.msk [vmem:[#allocation14] sm:$0xff] %vm368_vm5, %v363_v30 }
 0x368   :  { %1947 = vmatprep.subr.msk.bf16.mxu0 %vm2697_vm6, %v1945_v34  ;;  %2090 = vrot.lane.b32.xlu1 %v2089_v35, %s2390_s11 }
 0x369   :  { %v365_v37 = vpop.permute.xlu0 %364  ;;  %1950 = vmatpush3.bf16.xpose.msk.msra.mxu0 %vm2697_vm6, %v1945_v34 }
 0x36a   :  { %v1951_v38 = vpack.c.bf16 %v365_v37, %v380_v36  ;;  %v2094_v39 = vpack.i.bf16 %v365_v37, %v380_v36  ;;  %370 = vst.msk [vmem:[#allocation14 + $0x8] sm:$0xff] %vm368_vm5, %v365_v37 }
 0x36c   :  { %1953 = vmatprep.subr.msk.bf16.mxu1 %vm2697_vm6, %v1951_v38  ;;  %2095 = vrot.lane.b32.xlu0 %v2094_v39, %s2390_s11 }
 0x36d   :  { %389 = vrot.lane.b32.xlu1 %v301_v24, %s2391_s7  ;;  %1956 = vmatpush3.bf16.xpose.msk.msra.mxu1 %vm2697_vm6, %v1951_v38 }
 0x370   :  { %v386_v40 = vpop.permute.xlu1 %385 }
 0x371   :  { %393 = vrot.lane.b32.xlu1 %v302_v28, %s2391_s7  ;;  %391 = vrot.lane.b32.xlu0 %v386_v40, %s2391_s7 }
 0x372   :  { %1859 = vmatmul.mubr.msk.f32.vlgmr.msra.gmra.mrb[2].mxu0 %vm421_vm4, %v386_v40 }
 0x374   :  { %v388_v41 = vpop.permute.xlu0 %387 }
 0x375   :  { %1866 = vmatmul.mubr.msk.f32.vlgmr.msra.gmra.mrb[0].mxu1 %vm421_vm4, %v388_v41  ;;  %395 = vrot.lane.b32.xlu0 %v388_v41, %s2391_s7  ;;  %s2394_s7 = smov 48  }
 0x3da   :  { %v2091_v42 = vpop.permute.xlu1 %2090 }
 0x3db   :  { %v2093_v43 = vunpack.i.h.bf16 %v2091_v42  ;;  %v2092_v44 = vunpack.i.l.bf16 %v2091_v42 }
 0x3dd   :  { %v1957_v45 = vpack.c.bf16 %v2093_v43, %v2092_v44  ;;  %v382_v44 = vld [vmem:[%s3089_s14 + $0x8] sm:$0xff] }
 0x3de   :  { %v2096_v46 = vpop.permute.xlu0 %2095 }
 0x3df   :  { %v2098_v47 = vunpack.i.h.bf16 %v2096_v46  ;;  %v2097_v48 = vunpack.i.l.bf16 %v2096_v46  ;;  %v390_v49 = vpop.permute.xlu1 %389  ;;  %1959 = vmatprep.subr.msk.bf16.mxu0 %vm2697_vm6, %v1957_v45 }
 0x3e0   :  { %1872 = vmatprep.mubr.msk.f32.mxu0 %vm421_vm4, %v390_v49  ;;  %1962 = vmatpush3.bf16.xpose.msk.msra.mxu0 %vm2697_vm6, %v1957_v45 }
 0x3e1   :  { %v1963_v50 = vpack.c.bf16 %v2098_v47, %v2097_v48  ;;  %v381_v47 = vld [vmem:[%s3089_s14] sm:$0xff] }
 0x3e3   :  { %v394_v51 = vpop.permute.xlu1 %393  ;;  %1965 = vmatprep.subr.msk.bf16.mxu1 %vm2697_vm6, %v1963_v50  ;;  %v392_v52 = vpop.permute.xlu0 %391 }
 0x3e4   :  { %1879 = vmatprep.mubr.msk.f32.mxu1 %vm421_vm4, %v394_v51  ;;  %1968 = vmatpush3.bf16.xpose.msk.msra.mxu1 %vm2697_vm6, %v1963_v50 }
 0x3e7   :  { %1873 = vmatmul.mubr.msk.f32.vlgmr.msra.gmra.mrb[4].mxu0 %vm421_vm4, %v392_v52  ;;  %v396_v53 = vpop.permute.xlu0 %395 }
 0x3eb   :  { %1880 = vmatmul.mubr.msk.f32.vlgmr.msra.gmra.mrb[2].mxu1 %vm421_vm4, %v396_v53 }
 0x445   :  { %v1860_v54 = vpop.f32.mrb[2].mxu0 }
 0x446   :  { %v755_v55 = vmul.f32 0.25, %v1860_v54  ;;  %v496_v56 = vpop.f32.mrb[3].mxu0 }
 0x447   :  { %v754_v62 = vmul.f32 0.25, %v496_v56 }
 0x448   :  { %v1867_v57 = vpop.f32.mrb[0].mxu1  ;;  %v765_v58 = vsel %vm421_vm4, %v755_v55, -inf }
 0x449   :  { %v757_v59 = vmul.f32 0.25, %v1867_v57  ;;  %766 = vmax.xlane.f32.xlu0 %v765_v58  ;;  %v579_v60 = vpop.f32.mrb[1].mxu1  ;;  %v762_v3 = vsel %vm421_vm4, %v754_v62, -inf }
 0x44a   :  { %v756_v61 = vmul.f32 0.25, %v579_v60 }
 0x44b   :  { %v771_v63 = vsel %vm421_vm4, %v757_v59, -inf }
 0x44c   :  { %772 = vmax.xlane.f32.xlu1 %v771_v63  ;;  %v768_v2 = vsel %vm421_vm4, %v756_v61, -inf }
 0x44d   :  { %769 = vmax.xlane.f32.xlu0 %v768_v2 }
 0x450   :  { %763 = vmax.xlane.f32.xlu1 %v762_v3 }
 0x4ba   :  { %v1874_v4 = vpop.f32.mrb[4].mxu0 }
 0x4bb   :  { %v759_v5 = vmul.f32 0.25, %v1874_v4  ;;  %v662_v6 = vpop.f32.mrb[5].mxu0 }
 0x4bc   :  { %v758_v7 = vmul.f32 0.25, %v662_v6 }
 0x4bd   :  { %v777_v8 = vsel %vm421_vm4, %v759_v5, -inf }
 0x4be   :  { %v1881_v9 = vpop.f32.mrb[2].mxu1  ;;  %778 = vmax.xlane.f32.xlu1 %v777_v8  ;;  %v774_v10 = vsel %vm421_vm4, %v758_v7, -inf }
 0x4bf   :  { %v761_v11 = vmul.f32 0.25, %v1881_v9  ;;  %v745_v12 = vpop.f32.mrb[3].mxu1  ;;  %775 = vmax.xlane.f32.xlu0 %v774_v10 }
 0x4c0   :  { %v760_v13 = vmul.f32 0.25, %v745_v12 }
 0x4c1   :  { %v783_v14 = vsel %vm421_vm4, %v761_v11, -inf }
 0x4c2   :  { %784 = vmax.xlane.f32.xlu1 %v783_v14  ;;  %v780_v15 = vsel %vm421_vm4, %v760_v13, -inf }
 0x4c3   :  { %781 = vmax.xlane.f32.xlu0 %v780_v15 }
 0x4d3   :  { %373 = vrot.lane.b32.xlu1 %v2641_v31, %s2392_s8 }
 0x4d6   :  { %v767_v17 = vpop.xlane.xlu0 %766 }
 0x4d7   :  { %v787_v19 = vsub.f32 %v755_v55, %v767_v17 }
 0x4d9   :  { %371 = vrot.lane.b32.xlu0 %v2645_v32, %s2392_s8  ;;  %v773_v16 = vpop.xlane.xlu1 %772  ;;  %v796_v24 = vmul.f32 1.442695, %v787_v19 }
 0x4da   :  { %v789_v18 = vsub.f32 %v757_v59, %v773_v16  ;;  %v770_v21 = vpop.xlane.xlu0 %769 }
 0x4db   :  { %v788_v25 = vsub.f32 %v756_v61, %v770_v21 }
 0x4dc   :  { %v800_v22 = vmul.f32 1.442695, %v789_v18 }
 0x4dd   :  { %v764_v20 = vpop.xlane.xlu1 %763  ;;  %v798_v27 = vmul.f32 1.442695, %v788_v25 }
 0x4de   :  { %v786_v23 = vsub.f32 %v754_v62, %v764_v20  ;;  %2113 = vpow2.f32 %v800_v22 }
 0x4df   :  { %2115 = vpow2.f32 %v796_v24 }
 0x4e0   :  { %v794_v26 = vmul.f32 1.442695, %v786_v23 }
 0x4e2   :  { %2117 = vpow2.f32 %v794_v26 }
 0x4e3   :  { %2119 = vpow2.f32 %v798_v27 }
 0x4e8   :  { %v2739_v31 = vpop.eup %2113 }
 0x4e9   :  { %v2741_v28 = vpop.eup %2115  ;;  %v819_v32 = vsel %vm421_vm4, %v2739_v31, 0.0 }
 0x4ea   :  { %v813_v30 = vsel %vm421_vm4, %v2741_v28, 0.0 }
 0x4ec   :  { %v2745_v29 = vpop.eup %2117 }
 0x4ed   :  { %v2749_v33 = vpop.eup %2119  ;;  %v810_v34 = vsel %vm421_vm4, %v2745_v29, 0.0 }
 0x4ee   :  { %v816_v35 = vsel %vm421_vm4, %v2749_v33, 0.0 }
 0x4f7   :  { %820 = vadd.xlane.f32.xlu1 %v819_v32 }
 0x4f8   :  { %814 = vadd.xlane.f32.xlu0 %v813_v30 }
 0x4fb   :  { %811 = vadd.xlane.f32.xlu1 %v810_v34  ;;  %v1205_v34 = vld [vmem:[%s3077_s2] sm:$0xff] }
 0x4fc   :  { %817 = vadd.xlane.f32.xlu0 %v816_v35  ;;  %v1206_v35 = vld [vmem:[%s3077_s2 + $0x8] sm:$0xff] }
 0x54b   :  { %v779_v36 = vpop.xlane.xlu1 %778 }
 0x54c   :  { %v776_v37 = vpop.xlane.xlu0 %775  ;;  %v791_v38 = vsub.f32 %v759_v5, %v779_v36  ;;  %v1207_v36 = vld [vmem:[%s3077_s2 + $0x10] sm:$0xff] }
 0x54d   :  { %v790_v39 = vsub.f32 %v758_v7, %v776_v37  ;;  %v1985_v37 = vpack.c.bf16 %v1206_v35, %v1205_v34  ;;  %v1338_v34 = vld [vmem:[%s3078_s3 + $0x88] sm:$0xff] }
 0x54e   :  { %v804_v45 = vmul.f32 1.442695, %v791_v38  ;;  %v1208_v38 = vld [vmem:[%s3077_s2 + $0x18] sm:$0xff]  ;;  %v1342_v35 = vld [vmem:[%s3078_s3 + $0xa8] sm:$0xff] }
 0x54f   :  { %v785_v40 = vpop.xlane.xlu1 %784  ;;  %v802_v48 = vmul.f32 1.442695, %v790_v39  ;;  %v1989_v39 = vpack.c.bf16 %v1208_v38, %v1207_v36  ;;  %v1340_v36 = vld [vmem:[%s3078_s3 + $0x98] sm:$0xff] }
 0x550   :  { %v793_v41 = vsub.f32 %v761_v11, %v785_v40  ;;  %v782_v42 = vpop.xlane.xlu0 %781  ;;  %v1344_v38 = vld [vmem:[%s3078_s3 + $0xb8] sm:$0xff] }
 0x551   :  { %v792_v43 = vsub.f32 %v760_v13, %v782_v42 }
 0x552   :  { %v808_v46 = vmul.f32 1.442695, %v793_v41 }
 0x553   :  { %v806_v49 = vmul.f32 1.442695, %v792_v43  ;;  %v374_v50 = vpop.permute.xlu1 %373 }
 0x554   :  { %2121 = vpow2.f32 %v808_v46  ;;  %378 = vst.msk [vmem:[#allocation16 + $0x8] sm:$0xff] %vm368_vm5, %v374_v50  ;;  %v1973_v51 = vpack.c.bf16 %v374_v50, %v382_v44  ;;  %v372_v52 = vpop.permute.xlu0 %371  ;;  %v2104_v62 = vpack.i.bf16 %v374_v50, %v382_v44  ;;  %v1209_v44 = vld [vmem:[%s3077_s2 + $0x20] sm:$0xff] }
 0x555   :  { %2123 = vpow2.f32 %v806_v49  ;;  %377 = vst.msk [vmem:[#allocation16] sm:$0xff] %vm368_vm5, %v372_v52  ;;  %v1969_v53 = vpack.c.bf16 %v372_v52, %v381_v47  ;;  %v2099_v63 = vpack.i.bf16 %v372_v52, %v381_v47  ;;  %v1211_v47 = vld [vmem:[%s3077_s2 + $0x30] sm:$0xff] }
 0x556   :  { %2125 = vpow2.f32 %v804_v45  ;;  %1974 = vmatprep.subr.bf16.mxu1 %v1973_v51  ;;  %v1210_v45 = vld [vmem:[%s3077_s2 + $0x28] sm:$0xff] }
 0x557   :  { %2127 = vpow2.f32 %v802_v48  ;;  %1970 = vmatprep.subr.bf16.mxu0 %v1969_v53  ;;  %1976 = vmatpush3.bf16.msra.mxu1 %v1973_v51  ;;  %v1993_v46 = vpack.c.bf16 %v1210_v45, %v1209_v44  ;;  %v1212_v48 = vld [vmem:[%s3077_s2 + $0x38] sm:$0xff]  ;;  %v1343_v44 = vld [vmem:[%s3078_s3 + $0xb0] sm:$0xff] }
 0x558   :  { %1972 = vmatpush3.bf16.msra.mxu0 %v1969_v53  ;;  %v1997_v49 = vpack.c.bf16 %v1212_v48, %v1211_v47  ;;  %v1350_v47 = vld [vmem:[%s3078_s3 + $0xe8] sm:$0xff]  ;;  %v1348_v48 = vld [vmem:[%s3078_s3 + $0xd8] sm:$0xff] }
 0x55e   :  { %v2122_v54 = vpop.eup %2121 }
 0x55f   :  { %v2124_v55 = vpop.eup %2123  ;;  %v831_v56 = vsel %vm421_vm4, %v2122_v54, 0.0 }
 0x560   :  { %v2126_v57 = vpop.eup %2125  ;;  %832 = vadd.xlane.f32.xlu1 %v831_v56  ;;  %v828_v58 = vsel %vm421_vm4, %v2124_v55, 0.0 }
 0x561   :  { %v2128_v59 = vpop.eup %2127  ;;  %829 = vadd.xlane.f32.xlu0 %v828_v58  ;;  %v825_v60 = vsel %vm421_vm4, %v2126_v57, 0.0 }
 0x562   :  { %v822_v61 = vsel %vm421_vm4, %v2128_v59, 0.0 }
 0x564   :  { %826 = vadd.xlane.f32.xlu1 %v825_v60 }
 0x565   :  { %823 = vadd.xlane.f32.xlu0 %v822_v61 }
 0x575   :  { %2105 = vrot.lane.b32.xlu1 %v2104_v62, %s2390_s11 }
 0x57b   :  { %2100 = vrot.lane.b32.xlu0 %v2099_v63, %s2390_s11 }
 0x584   :  { %v821_v2 = vpop.xlane.xlu1 %820 }
 0x585   :  { %v815_v3 = vpop.xlane.xlu0 %814  ;;  %2129 = vrcp.f32 %v821_v2 }
 0x586   :  { %2131 = vrcp.f32 %v815_v3 }
 0x588   :  { %v812_v4 = vpop.xlane.xlu1 %811 }
 0x589   :  { %2133 = vrcp.f32 %v812_v4  ;;  %v818_v5 = vpop.xlane.xlu0 %817 }
 0x58a   :  { %2135 = vrcp.f32 %v818_v5 }
 0x58f   :  { %v2130_v6 = vpop.eup %2129 }
 0x590   :  { %v2132_v7 = vpop.eup %2131  ;;  %v841_v13 = vmul.f32 %v2130_v6, %v2739_v31 }
 0x591   :  { %v837_v11 = vmul.f32 %v2132_v7, %v2741_v28 }
 0x593   :  { %v2134_v8 = vpop.eup %2133 }
 0x594   :  { %v2136_v9 = vpop.eup %2135  ;;  %v835_v10 = vmul.f32 %v2134_v8, %v2745_v29 }
 0x595   :  { %v839_v12 = vmul.f32 %v2136_v9, %v2749_v33 }
 0x596   :  { %1886 = vmatprep.mubr.msk.f32.mxu0 %vm421_vm4, %v835_v10 }
 0x597   :  { %1887 = vmatmul.mubr.msk.f32.vlgmr.msra.gmra.mrb[6].mxu0 %vm421_vm4, %v837_v11  ;;  %1893 = vmatprep.mubr.msk.f32.mxu1 %vm421_vm4, %v839_v12  ;;  %v1324_v12 = vld [vmem:[%s3078_s3 + $0x18] sm:$0xff] }
 0x598   :  { %1894 = vmatmul.mubr.msk.f32.vlgmr.msra.gmra.mrb[4].mxu1 %vm421_vm4, %v841_v13 }
 0x5ed   :  { %v833_v14 = vpop.xlane.xlu1 %832 }
 0x5ee   :  { %2137 = vrcp.f32 %v833_v14  ;;  %v830_v15 = vpop.xlane.xlu0 %829  ;;  %v1328_v14 = vld [vmem:[%s3078_s3 + $0x38] sm:$0xff] }
 0x5ef   :  { %2139 = vrcp.f32 %v830_v15  ;;  %v1321_v15 = vld [vmem:[%s3078_s3] sm:$0xff] }
 0x5f1   :  { %v827_v16 = vpop.xlane.xlu1 %826 }
 0x5f2   :  { %2141 = vrcp.f32 %v827_v16  ;;  %v824_v17 = vpop.xlane.xlu0 %823  ;;  %v1325_v16 = vld [vmem:[%s3078_s3 + $0x20] sm:$0xff] }
 0x5f3   :  { %2143 = vrcp.f32 %v824_v17  ;;  %v2017_v17 = vpack.c.bf16 %v1328_v14, %v1324_v12  ;;  %v1546_v14 = vld [vmem:[%s3079_s4 + $0x8] sm:$0xff] }
 0x5f5   :  { %v2106_v18 = vpop.permute.xlu1 %2105 }
 0x5f6   :  { %v2108_v19 = vunpack.i.h.bf16 %v2106_v18  ;;  %v2107_v20 = vunpack.i.l.bf16 %v2106_v18  ;;  %v2101_v21 = vpop.permute.xlu0 %2100  ;;  %v2003_v18 = vpack.c.bf16 %v1325_v16, %v1321_v15  ;;  %v1563_v16 = vld [vmem:[%s3079_s4 + $0x90] sm:$0xff] }
 0x5f7   :  { %v2103_v22 = vunpack.i.h.bf16 %v2101_v21  ;;  %v2102_v23 = vunpack.i.l.bf16 %v2101_v21 }
 0x5f8   :  { %v2138_v24 = vpop.eup %2137  ;;  %v1981_v25 = vpack.c.bf16 %v2108_v19, %v2107_v20  ;;  %v1323_v19 = vld [vmem:[%s3078_s3 + $0x10] sm:$0xff] }
 0x5f9   :  { %v2140_v26 = vpop.eup %2139  ;;  %v1977_v27 = vpack.c.bf16 %v2103_v22, %v2102_v23  ;;  %v849_v32 = vmul.f32 %v2138_v24, %v2122_v54  ;;  %v1327_v20 = vld [vmem:[%s3078_s3 + $0x30] sm:$0xff]  ;;  %v1330_v22 = vld [vmem:[%s3078_s3 + $0x48] sm:$0xff]  ;;  %v1332_v24 = vld [vmem:[%s3078_s3 + $0x58] sm:$0xff] }
 0x5fa   :  { %1982 = vmatprep.subr.bf16.mxu1 %v1981_v25  ;;  %v847_v31 = vmul.f32 %v2140_v26, %v2124_v55  ;;  %v2019_v21 = vpack.c.bf16 %v1327_v20, %v1323_v19  ;;  %v1334_v23 = vld [vmem:[%s3078_s3 + $0x68] sm:$0xff]  ;;  %v1336_v26 = vld [vmem:[%s3078_s3 + $0x78] sm:$0xff]  ;;  %v1547_v19 = vld [vmem:[%s3079_s4 + $0x10] sm:$0xff] }
 0x5fb   :  { %1978 = vmatprep.subr.bf16.mxu0 %v1977_v27  ;;  %1984 = vmatpush3.bf16.msra.mxu1 %v1981_v25  ;;  %v2005_v25 = vpack.c.bf16 %v1334_v23, %v1330_v22  ;;  %v1548_v20 = vld [vmem:[%s3079_s4 + $0x18] sm:$0xff]  ;;  %v1565_v22 = vld [vmem:[%s3079_s4 + $0xa0] sm:$0xff]  ;;  %v1566_v23 = vld [vmem:[%s3079_s4 + $0xa8] sm:$0xff] }
 0x5fc   :  { %v2142_v28 = vpop.eup %2141  ;;  %1980 = vmatpush3.bf16.msra.mxu0 %v1977_v27  ;;  %1907 = vmatprep.mubr.msk.f32.mxu1 %vm421_vm4, %v847_v31  ;;  %v1329_v27 = vld [vmem:[%s3078_s3 + $0x40] sm:$0xff] }
 0x5fd   :  { %v2144_v29 = vpop.eup %2143  ;;  %v845_v33 = vmul.f32 %v2142_v28, %v2126_v57  ;;  %1986 = vmatprep.subr.bf16.mxu0 %v1985_v37  ;;  %v1333_v31 = vld [vmem:[%s3078_s3 + $0x60] sm:$0xff]  ;;  %v2021_v28 = vpack.c.bf16 %v1336_v26, %v1332_v24  ;;  %v2041_v24 = vpack.c.bf16 %v1566_v23, %v1565_v22  ;;  %v1550_v26 = vld [vmem:[%s3079_s4 + $0x28] sm:$0xff] }
 0x5fe   :  { %1908 = vmatmul.mubr.msk.f32.vlgmr.msra.gmra.mrb[6].mxu1 %vm421_vm4, %v849_v32  ;;  %v843_v30 = vmul.f32 %v2144_v29, %v2128_v59  ;;  %v2007_v32 = vpack.c.bf16 %v1333_v31, %v1329_v27  ;;  %v1331_v29 = vld [vmem:[%s3078_s3 + $0x50] sm:$0xff] }
 0x5ff   :  { %v1567_v31 = vld [vmem:[%s3079_s4 + $0xb0] sm:$0xff] }
 0x600   :  { %1900 = vmatprep.mubr.msk.f32.mxu0 %vm421_vm4, %v843_v30  ;;  %v1335_v30 = vld [vmem:[%s3078_s3 + $0x70] sm:$0xff] }
 0x601   :  { %1901 = vmatmul.mubr.msk.f32.vlgmr.msra.gmra.mrb[8].mxu0 %vm421_vm4, %v845_v33  ;;  %v2023_v33 = vpack.c.bf16 %v1335_v30, %v1331_v29  ;;  %v1551_v29 = vld [vmem:[%s3079_s4 + $0x30] sm:$0xff]  ;;  %v1552_v30 = vld [vmem:[%s3079_s4 + $0x38] sm:$0xff] }
 0x602   :  { %1988 = vmatpush3.bf16.msra.mxu0 %v1985_v37  ;;  %v2009_v37 = vpack.c.bf16 %v1342_v35, %v1338_v34  ;;  %v1569_v34 = vld [vmem:[%s3079_s4 + $0xc0] sm:$0xff]  ;;  %v1570_v35 = vld [vmem:[%s3079_s4 + $0xc8] sm:$0xff] }
 0x603   :  { %1990 = vmatprep.subr.bf16.mxu0 %v1989_v39 }
 0x606   :  { %1992 = vmatpush3.bf16.msra.mxu0 %v1989_v39  ;;  %v1337_v39 = vld [vmem:[%s3078_s3 + $0x80] sm:$0xff] }
 0x607   :  { %1994 = vmatprep.subr.bf16.mxu0 %v1993_v46 }
 0x60a   :  { %1996 = vmatpush3.bf16.msra.mxu0 %v1993_v46  ;;  %v1346_v46 = vld [vmem:[%s3078_s3 + $0xc8] sm:$0xff] }
 0x60b   :  { %1998 = vmatprep.subr.bf16.mxu0 %v1997_v49 }
 0x60e   :  { %2000 = vmatpush3.bf16.msra.mxu0 %v1997_v49  ;;  %v2013_v49 = vpack.c.bf16 %v1350_v47, %v1346_v46  ;;  %v1573_v46 = vld [vmem:[%s3079_s4 + $0xe0] sm:$0xff]  ;;  %v1574_v47 = vld [vmem:[%s3079_s4 + $0xe8] sm:$0xff] }
 0x60f   :  { %2018 = vmatprep.subr.bf16.mxu0 %v2017_v17  ;;  %v1564_v17 = vld [vmem:[%s3079_s4 + $0x98] sm:$0xff] }
 0x66a   :  { %v1888_v40 = vpop.f32.mrb[6].mxu0 }
 0x66b   :  { %1176 = vrot.lane.b32.xlu1 %v1888_v40, %s2393_s9  ;;  %v922_v41 = vpop.f32.mrb[7].mxu0  ;;  %v1895_v42 = vpop.f32.mrb[4].mxu1  ;;  %v1341_v40 = vld [vmem:[%s3078_s3 + $0xa0] sm:$0xff] }
 0x66c   :  { %1178 = vrot.lane.b32.xlu0 %v1895_v42, %s2393_s9  ;;  %v1003_v43 = vpop.f32.mrb[5].mxu1  ;;  %v2011_v42 = vpack.c.bf16 %v1341_v40, %v1337_v39  ;;  %v1571_v40 = vld [vmem:[%s3079_s4 + $0xd0] sm:$0xff] }
 0x6d1   :  { %v1909_v50 = vpop.f32.mrb[6].mxu1 }
 0x6d2   :  { %v1165_v51 = vpop.f32.mrb[7].mxu1 }
 0x6d3   :  { %1186 = vrot.lane.b32.xlu0 %v1165_v51, %s2392_s8  ;;  %v1345_v51 = vld [vmem:[%s3078_s3 + $0xc0] sm:$0xff] }
 0x6d4   :  { %v1902_v52 = vpop.f32.mrb[8].mxu0 }
 0x6d5   :  { %v1084_v53 = vpop.f32.mrb[9].mxu0 }
 0x6d6   :  { %1184 = vrot.lane.b32.xlu1 %v1084_v53, %s2392_s8 }
 0x6d7   :  { %1194 = vrot.lane.b32.xlu0 %v1909_v50, %s2394_s7  ;;  %v1352_v50 = vld [vmem:[%s3078_s3 + $0xf8] sm:$0xff] }
 0x6d8   :  { %v2029_v53 = vpack.c.bf16 %v1352_v50, %v1348_v48  ;;  %v2057_v48 = vpack.c.bf16 %v1574_v47, %v1573_v46  ;;  %v1558_v50 = vld [vmem:[%s3079_s4 + $0x68] sm:$0xff] }
 0x6da   :  { %1192 = vrot.lane.b32.xlu1 %v1902_v52, %s2394_s7  ;;  %v1349_v52 = vld [vmem:[%s3078_s3 + $0xe0] sm:$0xff] }
 0x6dd   :  { %v1177_v55 = vpop.permute.xlu1 %1176 }
 0x6de   :  { %v1179_v54 = vpop.permute.xlu0 %1178  ;;  %v1198_v58 = vsel %vm421_vm4, %v922_v41, %v1177_v55  ;;  %v2025_v41 = vpack.c.bf16 %v1344_v38, %v1340_v36  ;;  %v1347_v55 = vld [vmem:[%s3078_s3 + $0xd0] sm:$0xff]  ;;  %v2049_v36 = vpack.c.bf16 %v1570_v35, %v1569_v34  ;;  %v1554_v38 = vld [vmem:[%s3079_s4 + $0x48] sm:$0xff] }
 0x6df   :  { %v1199_v60 = vsel %vm421_vm4, %v1003_v43, %v1179_v54  ;;  %v1339_v43 = vld [vmem:[%s3078_s3 + $0x90] sm:$0xff]  ;;  %v2015_v54 = vpack.c.bf16 %v1349_v52, %v1345_v51 }
 0x6e0   :  { %v2027_v45 = vpack.c.bf16 %v1343_v44, %v1339_v43  ;;  %v1555_v43 = vld [vmem:[%s3079_s4 + $0x50] sm:$0xff]  ;;  %v1556_v44 = vld [vmem:[%s3079_s4 + $0x58] sm:$0xff] }
 0x6e1   :  { %v1575_v52 = vld [vmem:[%s3079_s4 + $0xf0] sm:$0xff] }
 0x745   :  { %v1187_v56 = vpop.permute.xlu0 %1186 }
 0x746   :  { %v1201_v63 = vsel %vm368_vm5, %v1199_v60, %v1187_v56  ;;  %v1351_v56 = vld [vmem:[%s3078_s3 + $0xf0] sm:$0xff] }
 0x748   :  { %v1185_v57 = vpop.permute.xlu1 %1184 }
 0x749   :  { %v1195_v59 = vpop.permute.xlu0 %1194  ;;  %v1200_v61 = vsel %vm368_vm5, %v1198_v58, %v1185_v57  ;;  %v2031_v57 = vpack.c.bf16 %v1351_v56, %v1347_v55  ;;  %v2395_v58 = vmov 0.0   ;;  %v1559_v55 = vld [vmem:[%s3079_s4 + $0x70] sm:$0xff]  ;;  %v1560_v56 = vld [vmem:[%s3079_s4 + $0x78] sm:$0xff] }
 0x74a   :  { %v1204_v3 = vsel %vm1202_vm7, %v1201_v63, %v1195_v59  ;;  %1423 = vmatprep.mubr.f32.mxu1 %v2395_v58 }
 0x74c   :  { %v1193_v62 = vpop.permute.xlu1 %1192 }
 0x74d   :  { %v1203_v2 = vsel %vm1202_vm7, %v1200_v61, %v1193_v62 }
 0x74e   :  { %1926 = vmatprep.mubr.msk.f32.mxu0 %vm142_vm0, %v1203_v2 }
 0x74f   :  { %1927 = vmatmul.mubr.msk.f32.vlgmr.msra.gmra.mrb[10].mxu0 %vm142_vm0, %v1204_v3 }
 0x750   :  { %2020 = vmatpush1.bf16.msra.mxu0 %v2019_v21  ;;  %1500 = vmatprep.mubr.f32.mxu0 %v2395_v58  ;;  %v2039_v21 = vpack.c.bf16 %v1548_v20, %v1547_v19 }
 0x751   :  { %2022 = vmatprep.subr.bf16.mxu0 %v2021_v28  ;;  %v1568_v28 = vld [vmem:[%s3079_s4 + $0xb8] sm:$0xff] }
 0x754   :  { %2024 = vmatpush1.bf16.msra.mxu0 %v2023_v33  ;;  %v2047_v33 = vpack.c.bf16 %v1552_v30, %v1551_v29 }
 0x755   :  { %2026 = vmatprep.subr.bf16.mxu0 %v2025_v41  ;;  %v1572_v41 = vld [vmem:[%s3079_s4 + $0xd8] sm:$0xff] }
 0x758   :  { %2028 = vmatpush1.bf16.msra.mxu0 %v2027_v45  ;;  %v2055_v45 = vpack.c.bf16 %v1556_v44, %v1555_v43 }
 0x759   :  { %2030 = vmatprep.subr.bf16.mxu0 %v2029_v53  ;;  %v1576_v53 = vld [vmem:[%s3079_s4 + $0xf8] sm:$0xff] }
 0x75c   :  { %2032 = vmatpush1.bf16.msra.mxu0 %v2031_v57  ;;  %v2063_v57 = vpack.c.bf16 %v1560_v56, %v1559_v55 }
 0x822   :  { %v1928_v4 = vpop.f32.mrb[10].mxu0 }
 0x823   :  { %v2814_v5 = vadd.f32 %v1928_v4, %v2602_v1  ;;  %v1285_v6 = vpop.f32.mrb[11].mxu0  ;;  %v1322_v1 = vld [vmem:[%s3078_s3 + $0x8] sm:$0xff] }
 0x824   :  { %v2817_v7 = vadd.f32 %v1285_v6, %v2600_v0  ;;  %v1326_v0 = vld [vmem:[%s3078_s3 + $0x28] sm:$0xff]  ;;  %v1736_v6 = vld [vmem:[%s3081_s6] ss:$0 sm:$0xff] }
 0x825   :  { %v1298_v8 = vmul.f32 %v2814_v5, %v2814_v5  ;;  %v2001_v13 = vpack.c.bf16 %v1326_v0, %v1322_v1  ;;  %v1561_v1 = vld [vmem:[%s3079_s4 + $0x80] sm:$0xff]  ;;  %v1562_v0 = vld [vmem:[%s3079_s4 + $0x88] sm:$0xff] }
 0x826   :  { %v1297_v9 = vmul.f32 %v2817_v7, %v2817_v7  ;;  %v2033_v12 = vpack.c.bf16 %v1562_v0, %v1561_v1 }
 0x827   :  { %v1302_v10 = vsel %vm142_vm0, %v1298_v8, 0.0  ;;  %2002 = vmatprep.subr.bf16.mxu1 %v2001_v13  ;;  %v1545_v13 = vld [vmem:[%s3079_s4] sm:$0xff] }
 0x828   :  { %1303 = vadd.xlane.f32.xlu0 %v1302_v10  ;;  %v1299_v11 = vsel %vm142_vm0, %v1297_v9, 0.0  ;;  %2004 = vmatpush1.bf16.msra.mxu1 %v2003_v18  ;;  %v2035_v15 = vpack.c.bf16 %v1546_v14, %v1545_v13  ;;  %v2037_v18 = vpack.c.bf16 %v1564_v17, %v1563_v16 }
 0x829   :  { %1300 = vadd.xlane.f32.xlu1 %v1299_v11  ;;  %2006 = vmatprep.subr.bf16.mxu1 %v2005_v25  ;;  %v1549_v25 = vld [vmem:[%s3079_s4 + $0x20] sm:$0xff] }
 0x82a   :  { %v2043_v27 = vpack.c.bf16 %v1550_v26, %v1549_v25 }
 0x82c   :  { %2008 = vmatpush1.bf16.msra.mxu1 %v2007_v32  ;;  %v2045_v32 = vpack.c.bf16 %v1568_v28, %v1567_v31 }
 0x82d   :  { %2010 = vmatprep.subr.bf16.mxu1 %v2009_v37  ;;  %v1553_v37 = vld [vmem:[%s3079_s4 + $0x40] sm:$0xff] }
 0x82e   :  { %v2051_v39 = vpack.c.bf16 %v1554_v38, %v1553_v37 }
 0x830   :  { %2012 = vmatpush1.bf16.msra.mxu1 %v2011_v42  ;;  %v2053_v42 = vpack.c.bf16 %v1572_v41, %v1571_v40 }
 0x831   :  { %2014 = vmatprep.subr.bf16.mxu1 %v2013_v49  ;;  %v1557_v49 = vld [vmem:[%s3079_s4 + $0x60] sm:$0xff]  ;;  %s2396_s4 = smov [#allocation14]  }
 0x832   :  { %v2059_v51 = vpack.c.bf16 %v1558_v50, %v1557_v49  ;;  %s1673_s12 = sshll.u32 %s2396_s4, 4  ;;  %s1674_s12 = int_to_ptr.vmem [resolvable:$true] %s1673_s12 }
 0x833   :  { %s2297_s1 = scalar_lea.vmem %s1674_s12, 256  ;;  %p2302_p7 = scmp.lt.s32.totalorder %s1674_s12, %s1674_s12 }
 0x834   :  { %2016 = vmatpush1.bf16.msra.mxu1 %v2015_v54  ;;  %v2061_v54 = vpack.c.bf16 %v1576_v53, %v1575_v52  ;;  %p2298_p6 = scmp.ne.s32.totalorder %s1674_s12, %s2297_s1  ;;  %p2303_p8 = scmp.lt.s32.totalorder %s2297_s1, %s2297_s1 }
 0x835   :  { %2034 = vmatprep.subr.bf16.mxu1 %v2033_v12 }
 0x836   :  { %p2304_p9 = por %p2303_p8, %p2302_p7 }
 0x838   :  { %p2305_p10 = pnand %p2304_p9, %p2298_p6 }
 0x8b5   :  { %v1304_v59 = vpop.xlane.xlu0 %1303 }
 0x8b6   :  { %v1306_v60 = vmul.f32 0.015625, %v1304_v59  ;;  %v1301_v61 = vpop.xlane.xlu1 %1300 }
 0x8b7   :  { %v1305_v62 = vmul.f32 0.015625, %v1301_v61 }
 0x8b8   :  { %v1308_v63 = vadd.f32 1e-05, %v1306_v60 }
 0x8b9   :  { %v1307_v2 = vadd.f32 1e-05, %v1305_v62 }
 0x8ba   :  { %2145 = vrsqrt.f32 %v1308_v63 }
 0x8bb   :  { %2147 = vrsqrt.f32 %v1307_v2 }
 0x8c4   :  { %v2146_v3 = vpop.eup %2145 }
 0x8c5   :  { %v2148_v4 = vpop.eup %2147  ;;  %v1312_v10 = vmul.f32 %v2146_v3, %v2814_v5 }
 0x8c6   :  { %v1311_v8 = vmul.f32 %v2148_v4, %v2817_v7 }
 0x8c7   :  { %v1320_v11 = vmul.f32 %v1736_v6, %v1312_v10 }
 0x8c8   :  { %v1319_v9 = vmul.f32 %v1736_v6, %v1311_v8 }
 0x8ca   :  { %1737 = vmatmul.mubr.msk.f32.vlgmr.msra.gmra.mrb[8].mxu1 %vm142_vm0, %v1319_v9  ;;  %1739 = vmatmul.mubr.msk.f32.vlgmr.msra.gmra.mrb[12].mxu0 %vm142_vm0, %v1319_v9 }
 0x8cb   :  { %1429 = vmatprep.mubr.f32.mxu1 %v2395_v58  ;;  %1506 = vmatprep.mubr.f32.mxu0 %v2395_v58 }
 0x8cc   :  { %2036 = vmatpush3.bf16.msra.mxu1 %v2035_v15 }
 0x8cd   :  { %2038 = vmatprep.subr.bf16.mxu1 %v2037_v18 }
 0x8ce   :  { %1738 = vmatmul.mubr.msk.f32.gmra.mrb[10].mxu1 %vm142_vm0, %v1320_v11  ;;  %1740 = vmatmul.mubr.msk.f32.gmra.mrb[14].mxu0 %vm142_vm0, %v1320_v11 }
 0x8d0   :  { %2040 = vmatpush3.bf16.msra.mxu1 %v2039_v21 }
 0x8d1   :  { %2042 = vmatprep.subr.bf16.mxu1 %v2041_v24 }
 0x8d4   :  { %2044 = vmatpush3.bf16.msra.mxu1 %v2043_v27 }
 0x8d5   :  { %2046 = vmatprep.subr.bf16.mxu1 %v2045_v32 }
 0x8d8   :  { %2048 = vmatpush3.bf16.msra.mxu1 %v2047_v33 }
 0x8d9   :  { %2050 = vmatprep.subr.bf16.mxu1 %v2049_v36 }
 0x8dc   :  { %2052 = vmatpush3.bf16.msra.mxu1 %v2051_v39 }
 0x8dd   :  { %2054 = vmatprep.subr.bf16.mxu1 %v2053_v42 }
 0x8e0   :  { %2056 = vmatpush3.bf16.msra.mxu1 %v2055_v45 }
 0x8e1   :  { %2058 = vmatprep.subr.bf16.mxu1 %v2057_v48 }
 0x8e4   :  { %2060 = vmatpush3.bf16.msra.mxu1 %v2059_v51 }
 0x8e5   :  { %2062 = vmatprep.subr.bf16.mxu1 %v2061_v54 }
 0x8e8   :  { %2064 = vmatpush3.bf16.msra.mxu1 %v2063_v57 }
 0x99d   :  { %v1425_v58 = vpop.f32.mrb[8].mxu1  ;;  %v1502_v59 = vpop.f32.mrb[12].mxu0 }
 0x99e   :  { %v1741_v60 = vmul.f32 -1.442695, %v1425_v58  ;;  %v1427_v61 = vpop.f32.mrb[9].mxu1  ;;  %v1504_v62 = vpop.f32.mrb[13].mxu0 }
 0x99f   :  { %v1742_v63 = vmul.f32 -1.442695, %v1427_v61 }
 0x9a0   :  { %2149 = vpow2.f32 %v1741_v60 }
 0x9a1   :  { %2151 = vpow2.f32 %v1742_v63  ;;  %v1431_v2 = vpop.f32.mrb[10].mxu1  ;;  %v1508_v3 = vpop.f32.mrb[14].mxu0 }
 0x9a2   :  { %v1743_v4 = vmul.f32 -1.442695, %v1431_v2  ;;  %v1433_v6 = vpop.f32.mrb[11].mxu1  ;;  %v1510_v8 = vpop.f32.mrb[15].mxu0 }
 0x9a3   :  { %v1744_v9 = vmul.f32 -1.442695, %v1433_v6 }
 0x9a4   :  { %2153 = vpow2.f32 %v1743_v4 }
 0x9a5   :  { %2155 = vpow2.f32 %v1744_v9 }
 0x9aa   :  { %v2150_v10 = vpop.eup %2149 }
 0x9ab   :  { %v2152_v11 = vpop.eup %2151  ;;  %v1525_v1 = vadd.f32 1.0, %v2150_v10 }
 0x9ac   :  { %v1526_v0 = vadd.f32 1.0, %v2152_v11 }
 0x9ad   :  { %2157 = vrcp.f32 %v1525_v1 }
 0x9ae   :  { %v2154_v12 = vpop.eup %2153  ;;  %2159 = vrcp.f32 %v1526_v0 }
 0x9af   :  { %v2156_v13 = vpop.eup %2155  ;;  %v1527_v14 = vadd.f32 1.0, %v2154_v12 }
 0x9b0   :  { %v1528_v15 = vadd.f32 1.0, %v2156_v13 }
 0x9b1   :  { %2161 = vrcp.f32 %v1527_v14 }
 0x9b2   :  { %2163 = vrcp.f32 %v1528_v15 }
 0x9b7   :  { %v2158_v16 = vpop.eup %2157 }
 0x9b8   :  { %v2160_v17 = vpop.eup %2159  ;;  %v1537_v18 = vmul.f32 %v2158_v16, %v1425_v58 }
 0x9b9   :  { %v1538_v19 = vmul.f32 %v2160_v17, %v1427_v61 }
 0x9ba   :  { %v1541_v20 = vmul.f32 %v1537_v18, %v1502_v59 }
 0x9bb   :  { %v2162_v21 = vpop.eup %2161  ;;  %v1542_v22 = vmul.f32 %v1538_v19, %v1504_v62 }
 0x9bc   :  { %v2164_v23 = vpop.eup %2163  ;;  %v1539_v24 = vmul.f32 %v2162_v21, %v1431_v2 }
 0x9bd   :  { %v1540_v25 = vmul.f32 %v2164_v23, %v1433_v6  ;;  %1641 = vmatprep.mubr.f32.mxu1 %v1542_v22 }
 0x9be   :  { %v1543_v26 = vmul.f32 %v1539_v24, %v1508_v3  ;;  %1642 = vmatmul.mubr.f32.vlgmr.msra.gmra.mrb[12].mxu1 %v1541_v20 }
 0x9bf   :  { %v1544_v27 = vmul.f32 %v1540_v25, %v1510_v8 }
 0x9c1   :  { %1646 = vmatprep.mubr.f32.mxu1 %v1544_v27 }
 0x9c2   :  { %1647 = vmatmul.mubr.f32.gmra.mrb[14].mxu1 %v1543_v26 }
 0x9c3   :  { %2308 = shalt.err (!%p2305_p10)
}
 0x9c4   :  { %s2309_s27 = scalar_lea.hbm %s3091_s16, 256 }
 0x9c5   :  { %p2310_p11 = scmp.ne.s32.totalorder %s3091_s16, %s2309_s27  ;;  %p2313_p12 = scmp.lt.u32.totalorder %s2309_s27, %s3091_s16 }
 0x9c7   :  { %p2315_p13 = pnand %p2313_p12, %p2310_p11 }
 0x9c9   :  { %2318 = shalt.err (!%p2315_p13)
}
 0x9ca   :  { %1679 = dma.vmem_to_hbm [thread:$0]  %s1674_s12, 256, %s3091_s16, [#allocation15], %s2377_s21, %s2377_s21, %s2378_s22  }
 0x9cb   :  { %s2397_s26 = smov [#allocation16]  }
 0x9cc   :  { %s1685_s10 = sshll.u32 %s2397_s26, 4  ;;  %s1686_s10 = int_to_ptr.vmem [resolvable:$true] %s1685_s10 }
 0x9cd   :  { %s2319_s3 = scalar_lea.vmem %s1686_s10, 256  ;;  %p2324_p1 = scmp.lt.s32.totalorder %s1686_s10, %s1686_s10 }
 0x9ce   :  { %p2320_p0 = scmp.ne.s32.totalorder %s1686_s10, %s2319_s3  ;;  %p2325_p2 = scmp.lt.s32.totalorder %s2319_s3, %s2319_s3 }
 0x9d0   :  { %p2326_p3 = por %p2325_p2, %p2324_p1 }
 0x9d2   :  { %p2327_p4 = pnand %p2326_p3, %p2320_p0 }
 0x9d4   :  { %2330 = shalt.err (!%p2327_p4)
}
 0x9d5   :  { %s2331_s6 = scalar_lea.hbm %s3092_s17, 256 }
 0x9d6   :  { %p2332_p5 = scmp.ne.s32.totalorder %s3092_s17, %s2331_s6  ;;  %p2335_p6 = scmp.lt.u32.totalorder %s2331_s6, %s3092_s17 }
 0x9d8   :  { %p2337_p7 = pnand %p2335_p6, %p2332_p5 }
 0x9da   :  { %2340 = shalt.err (!%p2337_p7)
}
 0x9db   :  { %1691 = dma.vmem_to_hbm [thread:$0]  %s1686_s10, 256, %s3092_s17, [#allocation15], %s2377_s21, %s2377_s21, %s2378_s22  }
 0x9dc   :  { %s2398_s2 = smov [#allocation13]  }
 0x9dd   :  { %s1661_s8 = sshll.u32 %s2398_s2, 4  ;;  %s1662_s8 = int_to_ptr.vmem [resolvable:$true] %s1661_s8 }
 0x9de   :  { %s2341_s25 = scalar_lea.vmem %s1662_s8, 256  ;;  %p2346_p9 = scmp.lt.s32.totalorder %s1662_s8, %s1662_s8 }
 0x9df   :  { %p2342_p8 = scmp.ne.s32.totalorder %s1662_s8, %s2341_s25  ;;  %p2347_p10 = scmp.lt.s32.totalorder %s2341_s25, %s2341_s25 }
 0x9e1   :  { %p2348_p11 = por %p2347_p10, %p2346_p9 }
 0x9e3   :  { %p2349_p12 = pnand %p2348_p11, %p2342_p8 }
 0xa91   :  { %v1829_v31 = vpop.f32.mrb[12].mxu1 }
 0xa92   :  { %v1830_v28 = vpop.f32.mrb[13].mxu1 }
 0xa93   :  { %v1831_v32 = vadd.f32 %v1830_v28, %v1829_v31 }
 0xa95   :  { %v1652_v29 = vadd.f32 %v1831_v32, %v2817_v7  ;;  %v1832_v30 = vpop.f32.mrb[14].mxu1 }
 0xa96   :  { %v1833_v33 = vpop.f32.mrb[15].mxu1 }
 0xa97   :  { %1654 = vst.msk [vmem:[#allocation13] sm:$0xff] %vm142_vm0, %v1652_v29  ;;  %v1834_v34 = vadd.f32 %v1833_v33, %v1832_v30 }
 0xa99   :  { %v1653_v35 = vadd.f32 %v1834_v34, %v2814_v5 }
 0xa9b   :  { %1655 = vst.msk [vmem:[#allocation13 + $0x8] sm:$0xff] %vm142_vm0, %v1653_v35 }
 0xa9c   :  { %2352 = shalt.err (!%p2349_p12)
}
 0xa9d   :  { %s3103_s4 = sld [smem:[#allocation25_spill]] }
 0xaa3   :  { %s2353_s12 = scalar_lea.hbm %s3103_s4, 256 }
 0xaa4   :  { %p2354_p13 = scmp.ne.s32.totalorder %s3103_s4, %s2353_s12  ;;  %p2357_p0 = scmp.lt.u32.totalorder %s2353_s12, %s3103_s4 }
 0xaa6   :  { %p2359_p1 = pnand %p2357_p0, %p2354_p13 }
 0xaa8   :  { %2362 = shalt.err (!%p2359_p1)
}
 0xaa9   :  { %1667 = dma.vmem_to_hbm [thread:$0]  %s1662_s8, 256, %s3103_s4, [#allocation4], %s2377_s21, %s2377_s21, %s2378_s22  }
 0xaaa   :  { %2371 = dma.done.wait [#allocation4], 256  }
 0xaab   :  { %2372 = vsyncadd [#allocation4], 4294967040 }
 0xaac   :  { %2373 = dma.done.wait [#allocation15], 512  }
 0xaad   :  { %2374 = vsyncadd [#allocation15], 4294966784 }
 0xaae   :  { %1701 = vsyncpa [#allocation3], 1 }
 0xaaf   :  { %1702 = vsyncpa [#allocation6], 1 }
 0xab0   :  { %1703 = vsyncpa [#allocation9], 1 }
 0xab1   :  { %1704 = vsyncpa [#allocation12], 1 }
 0xab2   :  { %1705 = vsyncpa [#allocation4], 1 }
 0xab3   :  { %1706 = vsyncpa [#allocation15], 1 }

</bundles_post_ra>
